<compile_context>
chip_gen: v7x
topology: tpu7x:2x2x1
jax: 0.10.0
libtpu: 0.0.40
codegen_flags: <defaults>
</compile_context>

<pallas_src>
import functools

import jax
import jax.numpy as jnp
from jax import lax
from jax.experimental import pallas as pl
from jax.experimental.pallas import tpu as pltpu


def _round_up(x, m):
    return ((x + m - 1) // m) * m


def _pick_time_chunk(T, max_chunk):
    """Chunk minimizing padded-steps + per-grid-step overhead (T is padded up
    to a multiple of the chunk, so awkward T never degrades to chunk=1)."""
    best_c, best_score = 1, None
    for c in range(1, max(1, min(T, max_chunk)) + 1):
        n = -(-T // c)                       # number of chunks
        score = n * c + 4 * n                # padded serial steps + grid overhead
        if best_score is None or score < best_score or (score == best_score and c > best_c):
            best_c, best_score = c, score
    return best_c


def _vmem_limit_bytes(chunk, B, Hb):
    """Double-buffered blocks + resident weights + state, with headroom."""
    Bp = max(8, _round_up(B, 8))
    g4 = _round_up(4 * Hb, 128)
    hb = _round_up(Hb, 128)
    gx_blk = chunk * Bp * g4 * 2             # bf16 gx chunk (per direction)
    out_blk = chunk * Bp * hb * 4            # f32 out chunk (per direction)
    whh = 2 * _round_up(Hb, 16) * g4 * 2     # bf16 W_hh, both directions
    state = 4 * Bp * hb * 4                  # h/c scratch
    need = 2 * 2 * gx_blk + 2 * 2 * out_blk + 2 * whh + state
    return int(min(64 << 20, max(need + (4 << 20), 16 << 20)))


def _sigmoid_tanh(x):
    # sigmoid expressed through tanh: a single EUP push instead of exp + recip.
    return 0.5 * (jnp.tanh(0.5 * x) + 1.0)


# ----------------------------------------------------------------------------
# Pallas kernel: one time chunk, BOTH directions fused.
#   grid = (nT,): time-chunk axis ("arbitrary"; h/c scratch carries state).
# ----------------------------------------------------------------------------
def _bilstm_fused_kernel(gx_f_ref, gx_b_ref, whh_ref, out_f_ref, out_b_ref,
                         h_f, c_f, h_b, c_b, *, hidden_b, chunk):
    """gx_f_ref: (Tc,B,4Hb) bf16  x@W_ih+b, forward,  chunk t
       gx_b_ref: (Tc,B,4Hb) bf16  x@W_ih+b, backward, chunk nT-1-t
       whh_ref : (2,Hb,4Hb) bf16  hidden->gate weights (fwd, bwd), resident
       out_*   : (Tc,B,Hb)  f32   hidden-state outputs
       h_*/c_* : (B,Hb)     f32   recurrent state, persists across chunks
       Gate bands (PyTorch order i,f,g,o) sit at lanes [k*Hb, (k+1)*Hb)."""
    Hb = hidden_b

    @pl.when(pl.program_id(0) == 0)          # first chunk only
    def _init_state():
        for r in (h_f, c_f, h_b, c_b):
            r[...] = jnp.zeros(r.shape, r.dtype)

    def cell(gates, c_prev):
        i = _sigmoid_tanh(gates[:, 0 * Hb:1 * Hb])
        f = _sigmoid_tanh(gates[:, 1 * Hb:2 * Hb])
        g = jnp.tanh(gates[:, 2 * Hb:3 * Hb])
        o = _sigmoid_tanh(gates[:, 3 * Hb:4 * Hb])
        c_new = f * c_prev + i * g
        return o * jnp.tanh(c_new), c_new

    # Static Python unroll: every gx load / out store uses a static offset, so
    # the scheduler can prefetch step s+1 and issue unmasked stores.
    for s in range(chunk):
        sb = chunk - 1 - s
        # --- forward direction, in-chunk time s ---
        gates = gx_f_ref[s].astype(jnp.float32) + jnp.dot(
            h_f[...].astype(jnp.bfloat16), whh_ref[0],
            preferred_element_type=jnp.float32)
        h_new, c_new = cell(gates, c_f[...])
        h_f[...] = h_new
        c_f[...] = c_new
        out_f_ref[s] = h_new.astype(out_f_ref.dtype)
        # --- backward direction, in-chunk time sb (chunks arrive reversed) ---
        gates = gx_b_ref[sb].astype(jnp.float32) + jnp.dot(
            h_b[...].astype(jnp.bfloat16), whh_ref[1],
            preferred_element_type=jnp.float32)
        h_new, c_new = cell(gates, c_b[...])
        h_b[...] = h_new
        c_b[...] = c_new
        out_b_ref[sb] = h_new.astype(out_b_ref.dtype)


def _bilstm_layer(x_tm, wih_all, whh_all, b_all, *, hidden, hidden_b, chunk):
    """One bidirectional LSTM layer.
       x_tm: (T,B,Din) f32 time-major input; returns (T,B,2H) f32."""
    T, B, _ = x_tm.shape
    H, Hb = hidden, hidden_b
    Tp = _round_up(T, chunk)
    nT = Tp // chunk
    pad = Tp - T

    # Hoisted input projection: one big bf16 MXU matmul over all timesteps and
    # both directions (default precision), bias folded in f32, stored bf16.
    gx = jnp.einsum("tbd,zdg->ztbg", x_tm.astype(jnp.bfloat16), wih_all,
                    preferred_element_type=jnp.float32) + b_all[:, None, None, :]
    gx = gx.astype(jnp.bfloat16)
    # fwd padded at the END (garbage tail sliced off); bwd padded at the FRONT
    # so its descending walk finishes all real timesteps before padded ones.
    gx_f = jnp.pad(gx[0], ((0, pad), (0, 0), (0, 0)))
    gx_b = jnp.pad(gx[1], ((pad, 0), (0, 0), (0, 0)))

    kernel = functools.partial(_bilstm_fused_kernel, hidden_b=Hb, chunk=chunk)
    out_f, out_b = pl.pallas_call(
        kernel,
        out_shape=(jax.ShapeDtypeStruct((Tp, B, Hb), jnp.float32),
                   jax.ShapeDtypeStruct((Tp, B, Hb), jnp.float32)),
        grid_spec=pltpu.PrefetchScalarGridSpec(
            num_scalar_prefetch=0,
            grid=(nT,),
            in_specs=[
                pl.BlockSpec((chunk, B, 4 * Hb), lambda t: (t, 0, 0)),
                pl.BlockSpec((chunk, B, 4 * Hb), lambda t: (nT - 1 - t, 0, 0)),
                pl.BlockSpec((2, Hb, 4 * Hb), lambda t: (0, 0, 0)),
            ],
            out_specs=[
                pl.BlockSpec((chunk, B, Hb), lambda t: (t, 0, 0)),
                pl.BlockSpec((chunk, B, Hb), lambda t: (nT - 1 - t, 0, 0)),
            ],
            scratch_shapes=[pltpu.VMEM((B, Hb), jnp.float32)] * 4,
        ),
        compiler_params=pltpu.CompilerParams(
            dimension_semantics=("arbitrary",),
            vmem_limit_bytes=_vmem_limit_bytes(chunk, B, Hb),
        ),
    )(gx_f, gx_b, whh_all)

    # Strip time padding and lane padding; concat fwd|bwd (true width 2H).
    return jnp.concatenate([out_f[:T, :, :H], out_b[pad:, :, :H]], axis=-1)


def _pad_gate_cols(mat, H, Hb):
    """(rows, 4H) PyTorch gate order -> (rows, 4Hb): gate k at lanes [k*Hb, k*Hb+H)."""
    parts = [jnp.pad(mat[:, k * H:(k + 1) * H], ((0, 0), (0, Hb - H))) for k in range(4)]
    return jnp.concatenate(parts, axis=1)


# ----------------------------------------------------------------------------
# Module: EncoderWithRNN  (nn.LSTM(in_channels, hidden, num_layers=2,
#                          batch_first=True, bidirectional=True))
# ----------------------------------------------------------------------------
class EncoderWithRNNPallas:
    def __init__(self, in_channels, hidden_size, key, max_time_chunk=32):
        self.in_channels = in_channels
        self.hidden_size = hidden_size
        self.hidden_b = max(32, _round_up(hidden_size, 32))   # 4*Hb % 128 == 0
        self.out_channels = hidden_size * 2
        self.max_time_chunk = max_time_chunk

        H, Hb = hidden_size, self.hidden_b
        k = 1.0 / jnp.sqrt(jnp.float32(H))

        def uniform(rng, shape):
            return jax.random.uniform(rng, shape, jnp.float32, -k, k)

        # Raw PyTorch-layout params (kept for the pure-JAX reference).
        self.raw = {}
        rngs = jax.random.split(key, 16)
        ri = iter(range(16))
        for layer, d_in in ((0, in_channels), (1, 2 * H)):
            for direction in ("fwd", "bwd"):
                self.raw[(layer, direction)] = (
                    uniform(rngs[next(ri)], (4 * H, d_in)),   # w_ih
                    uniform(rngs[next(ri)], (4 * H, H)),      # w_hh
                    uniform(rngs[next(ri)], (4 * H,)),        # b_ih
                    uniform(rngs[next(ri)], (4 * H,)),        # b_hh
                )

        # Packed / padded / bf16 weights for the kernel (f32 bias).
        self.packed = []
        for layer in (0, 1):
            wih_l, whh_l, b_l = [], [], []
            for direction in ("fwd", "bwd"):
                w_ih, w_hh, b_ih, b_hh = self.raw[(layer, direction)]
                wih_l.append(_pad_gate_cols(w_ih.T, H, Hb).astype(jnp.bfloat16))
                whh_g = _pad_gate_cols(w_hh.T, H, Hb)                 # (H, 4Hb)
                whh_l.append(jnp.pad(whh_g, ((0, Hb - H), (0, 0))).astype(jnp.bfloat16))
                b_l.append(_pad_gate_cols((b_ih + b_hh).reshape(1, 4 * H), H, Hb)[0])
            self.packed.append((jnp.stack(wih_l),     # (2, Din, 4Hb) bf16
                                jnp.stack(whh_l),     # (2, Hb, 4Hb)  bf16
                                jnp.stack(b_l)))      # (2, 4Hb)      f32

    def __call__(self, x):
        # x: (B, T, in_channels) -> (B, T, 2*hidden)
        H, Hb = self.hidden_size, self.hidden_b
        _, T, _ = x.shape
        chunk = _pick_time_chunk(T, self.max_time_chunk)

        y = jnp.transpose(x, (1, 0, 2)).astype(jnp.float32)   # single time-major transpose
        for layer in (0, 1):
            wih_all, whh_all, b_all = self.packed[layer]
            y = _bilstm_layer(y, wih_all, whh_all, b_all,
                              hidden=H, hidden_b=Hb, chunk=chunk)     # (T, B, 2H)
        return jnp.transpose(y, (1, 0, 2))

    # Pure-JAX f32 reference (lax.scan) for correctness checking.
    def reference(self, x):
        def one_dir(x_btd, w_ih, w_hh, b_ih, b_hh, reverse):
            B, T, D = x_btd.shape
            H = w_hh.shape[1]
            xs = jnp.transpose(x_btd, (1, 0, 2))
            if reverse:
                xs = xs[::-1]

            def step(carry, x_t):
                h, c = carry
                gates = x_t @ w_ih.T + h @ w_hh.T + b_ih + b_hh
                i, f, g, o = jnp.split(gates, 4, axis=-1)
                i = jax.nn.sigmoid(i)
                f = jax.nn.sigmoid(f)
                g = jnp.tanh(g)
                o = jax.nn.sigmoid(o)
                c = f * c + i * g
                h = o * jnp.tanh(c)
                return (h, c), h

            init = (jnp.zeros((B, H), jnp.float32), jnp.zeros((B, H), jnp.float32))
            _, ys = lax.scan(step, init, xs)
            if reverse:
                ys = ys[::-1]
            return jnp.transpose(ys, (1, 0, 2))

        y = x
        for layer in (0, 1):
            fwd = one_dir(y, *self.raw[(layer, "fwd")], reverse=False)
            bwd = one_dir(y, *self.raw[(layer, "bwd")], reverse=True)
            y = jnp.concatenate([fwd, bwd], axis=-1)
        return y


if __name__ == "__main__":
    B, T, C, H = 2, 8, 16, 32
    key = jax.random.PRNGKey(0)
    kx, kp = jax.random.split(key)
    x = jax.random.normal(kx, (B, T, C), dtype=jnp.float32)

    # max_time_chunk=4 -> T=8 streams as 2 chunks, exercising the cross-chunk
    # h/c carry and the reversed-chunk backward mapping.
    enc = EncoderWithRNNPallas(in_channels=C, hidden_size=H, key=kp, max_time_chunk=4)

    y = jax.block_until_ready(enc(x))
    assert y.shape == (B, T, 2 * H), y.shape
    y_ref = jax.block_until_ready(enc.reference(x))
    err = float(jnp.abs(y - y_ref).max())
    # bf16 matmul operands (f32 accumulation, f32 state) -> bf16-level tolerance.
    assert jnp.allclose(y, y_ref, atol=2e-2, rtol=2e-2), err

    # Awkward length: T=7 pads to 8 (fwd padded at the end, bwd at the front).
    x2 = x[:, :7, :]
    y2 = jax.block_until_ready(enc(x2))
    y2_ref = jax.block_until_ready(enc.reference(x2))
    err2 = float(jnp.abs(y2 - y2_ref).max())
    assert y2.shape == (B, 7, 2 * H), y2.shape
    assert jnp.allclose(y2, y2_ref, atol=2e-2, rtol=2e-2), err2

    print("KERNEL_OK")
</pallas_src>

<mosaic_0001>
module attributes {stable_mosaic.version = 11 : i64} {
  func.func @_bilstm_fused_kernel(%arg0: i32, %arg1: memref<4x2x128xbf16, #tpu.memory_space<vmem>>, %arg2: memref<4x2x128xbf16, #tpu.memory_space<vmem>>, %arg3: memref<2x32x128xbf16, #tpu.memory_space<vmem>>, %arg4: memref<4x2x32xf32, #tpu.memory_space<vmem>>, %arg5: memref<4x2x32xf32, #tpu.memory_space<vmem>>, %arg6: memref<2x32xf32, #tpu.memory_space<vmem>>, %arg7: memref<2x32xf32, #tpu.memory_space<vmem>>, %arg8: memref<2x32xf32, #tpu.memory_space<vmem>>, %arg9: memref<2x32xf32, #tpu.memory_space<vmem>>) attributes {dimension_semantics = [#tpu.dimension_semantics<arbitrary>], iteration_bounds = array<i64: 2>, scalar_prefetch = 0 : i64, scratch_operands = 4 : i64, tpu.core_type = #tpu.core_type<tc>, window_params = [{transform_indices = @transform_0, window_bounds = array<i64: 4, 2, 128>}, {transform_indices = @transform_1, window_bounds = array<i64: 4, 2, 128>}, {pipeline_mode = #tpu.pipeline_mode<synchronous>, transform_indices = @transform_2, window_bounds = array<i64: 2, 32, 128>}, {transform_indices = @transform_3, window_bounds = array<i64: 4, 2, 32>}, {transform_indices = @transform_4, window_bounds = array<i64: 4, 2, 32>}]} {
    %c0_i32 = arith.constant 0 : i32
    %0 = arith.cmpi eq, %arg0, %c0_i32 : i32
    %1 = arith.extui %0 : i1 to i32
    %c0_i32_0 = arith.constant 0 : i32
    %2 = arith.cmpi ne, %1, %c0_i32_0 : i32
    scf.if %2 {
      %cst_212 = arith.constant 0.000000e+00 : f32
      %371 = vector.broadcast %cst_212 : f32 to vector<2x32xf32>
      %c0_213 = arith.constant 0 : index
      %c0_214 = arith.constant 0 : index
      %372 = vector.load %arg6[%c0_213, %c0_214] : memref<2x32xf32, #tpu.memory_space<vmem>>, vector<2x32xf32>
      tpu.vector_store %arg6[%c0_213, %c0_214], %371 {strides = array<i32>} : memref<2x32xf32, #tpu.memory_space<vmem>>, vector<2x32xf32>,
      %cst_215 = arith.constant 0.000000e+00 : f32
      %373 = vector.broadcast %cst_215 : f32 to vector<2x32xf32>
      %c0_216 = arith.constant 0 : index
      %c0_217 = arith.constant 0 : index
      %374 = vector.load %arg7[%c0_216, %c0_217] : memref<2x32xf32, #tpu.memory_space<vmem>>, vector<2x32xf32>
      tpu.vector_store %arg7[%c0_216, %c0_217], %373 {strides = array<i32>} : memref<2x32xf32, #tpu.memory_space<vmem>>, vector<2x32xf32>,
      %cst_218 = arith.constant 0.000000e+00 : f32
      %375 = vector.broadcast %cst_218 : f32 to vector<2x32xf32>
      %c0_219 = arith.constant 0 : index
      %c0_220 = arith.constant 0 : index
      %376 = vector.load %arg8[%c0_219, %c0_220] : memref<2x32xf32, #tpu.memory_space<vmem>>, vector<2x32xf32>
      tpu.vector_store %arg8[%c0_219, %c0_220], %375 {strides = array<i32>} : memref<2x32xf32, #tpu.memory_space<vmem>>, vector<2x32xf32>,
      %cst_221 = arith.constant 0.000000e+00 : f32
      %377 = vector.broadcast %cst_221 : f32 to vector<2x32xf32>
      %c0_222 = arith.constant 0 : index
      %c0_223 = arith.constant 0 : index
      %378 = vector.load %arg9[%c0_222, %c0_223] : memref<2x32xf32, #tpu.memory_space<vmem>>, vector<2x32xf32>
      tpu.vector_store %arg9[%c0_222, %c0_223], %377 {strides = array<i32>} : memref<2x32xf32, #tpu.memory_space<vmem>>, vector<2x32xf32>,
    } else {
    }
    %c0 = arith.constant 0 : index
    %c0_1 = arith.constant 0 : index
    %c0_2 = arith.constant 0 : index
    %3 = vector.load %arg1[%c0, %c0_1, %c0_2] : memref<4x2x128xbf16, #tpu.memory_space<vmem>>, vector<1x2x128xbf16>
    %4 = vector.shape_cast %3 : vector<1x2x128xbf16> to vector<2x128xbf16>
    %5 = arith.extf %4 : vector<2x128xbf16> to vector<2x128xf32>
    %c0_3 = arith.constant 0 : index
    %c0_4 = arith.constant 0 : index
    %6 = vector.load %arg6[%c0_3, %c0_4] : memref<2x32xf32, #tpu.memory_space<vmem>>, vector<2x32xf32>
    %7 = arith.truncf %6 : vector<2x32xf32> to vector<2x32xbf16>
    %c0_5 = arith.constant 0 : index
    %c0_6 = arith.constant 0 : index
    %c0_7 = arith.constant 0 : index
    %8 = vector.load %arg3[%c0_5, %c0_6, %c0_7] : memref<2x32x128xbf16, #tpu.memory_space<vmem>>, vector<1x32x128xbf16>
    %9 = vector.shape_cast %8 : vector<1x32x128xbf16> to vector<32x128xbf16>
    %cst = arith.constant dense<0.000000e+00> : vector<2x128xf32>
    %10 = tpu.matmul %7, %9, %cst {dimension_numbers = #tpu.dot_dimension_numbers<[1], [0], [0], [1], [0, 0, 1, 1], [], []>} : vector<2x32xbf16>, vector<32x128xbf16>, vector<2x128xf32> -> vector<2x128xf32>
    %11 = arith.addf %5, %10 : vector<2x128xf32>
    %c0_8 = arith.constant 0 : index
    %c0_9 = arith.constant 0 : index
    %12 = vector.load %arg7[%c0_8, %c0_9] : memref<2x32xf32, #tpu.memory_space<vmem>>, vector<2x32xf32>
    %13 = vector.extract_strided_slice %11 {offsets = [0, 0], sizes = [2, 32], strides = [1, 1]} : vector<2x128xf32> to vector<2x32xf32>
    %cst_10 = arith.constant 5.000000e-01 : f32
    %14 = vector.broadcast %cst_10 : f32 to vector<2x32xf32>
    %15 = arith.mulf %14, %13 : vector<2x32xf32>
    %16 = math.tanh %15 : vector<2x32xf32>
    %cst_11 = arith.constant 1.000000e+00 : f32
    %17 = vector.broadcast %cst_11 : f32 to vector<2x32xf32>
    %18 = arith.addf %16, %17 : vector<2x32xf32>
    %cst_12 = arith.constant 5.000000e-01 : f32
    %19 = vector.broadcast %cst_12 : f32 to vector<2x32xf32>
    %20 = arith.mulf %19, %18 : vector<2x32xf32>
    %21 = vector.extract_strided_slice %11 {offsets = [0, 32], sizes = [2, 32], strides = [1, 1]} : vector<2x128xf32> to vector<2x32xf32>
    %cst_13 = arith.constant 5.000000e-01 : f32
    %22 = vector.broadcast %cst_13 : f32 to vector<2x32xf32>
    %23 = arith.mulf %22, %21 : vector<2x32xf32>
    %24 = math.tanh %23 : vector<2x32xf32>
    %cst_14 = arith.constant 1.000000e+00 : f32
    %25 = vector.broadcast %cst_14 : f32 to vector<2x32xf32>
    %26 = arith.addf %24, %25 : vector<2x32xf32>
    %cst_15 = arith.constant 5.000000e-01 : f32
    %27 = vector.broadcast %cst_15 : f32 to vector<2x32xf32>
    %28 = arith.mulf %27, %26 : vector<2x32xf32>
    %29 = vector.extract_strided_slice %11 {offsets = [0, 64], sizes = [2, 32], strides = [1, 1]} : vector<2x128xf32> to vector<2x32xf32>
    %30 = math.tanh %29 : vector<2x32xf32>
    %31 = vector.extract_strided_slice %11 {offsets = [0, 96], sizes = [2, 32], strides = [1, 1]} : vector<2x128xf32> to vector<2x32xf32>
    %cst_16 = arith.constant 5.000000e-01 : f32
    %32 = vector.broadcast %cst_16 : f32 to vector<2x32xf32>
    %33 = arith.mulf %32, %31 : vector<2x32xf32>
    %34 = math.tanh %33 : vector<2x32xf32>
    %cst_17 = arith.constant 1.000000e+00 : f32
    %35 = vector.broadcast %cst_17 : f32 to vector<2x32xf32>
    %36 = arith.addf %34, %35 : vector<2x32xf32>
    %cst_18 = arith.constant 5.000000e-01 : f32
    %37 = vector.broadcast %cst_18 : f32 to vector<2x32xf32>
    %38 = arith.mulf %37, %36 : vector<2x32xf32>
    %39 = arith.mulf %28, %12 : vector<2x32xf32>
    %40 = arith.mulf %20, %30 : vector<2x32xf32>
    %41 = arith.addf %39, %40 : vector<2x32xf32>
    %42 = math.tanh %41 : vector<2x32xf32>
    %43 = arith.mulf %38, %42 : vector<2x32xf32>
    %c0_19 = arith.constant 0 : index
    %c0_20 = arith.constant 0 : index
    %44 = vector.load %arg6[%c0_19, %c0_20] : memref<2x32xf32, #tpu.memory_space<vmem>>, vector<2x32xf32>
    tpu.vector_store %arg6[%c0_19, %c0_20], %43 {strides = array<i32>} : memref<2x32xf32, #tpu.memory_space<vmem>>, vector<2x32xf32>,
    %c0_21 = arith.constant 0 : index
    %c0_22 = arith.constant 0 : index
    %45 = vector.load %arg7[%c0_21, %c0_22] : memref<2x32xf32, #tpu.memory_space<vmem>>, vector<2x32xf32>
    tpu.vector_store %arg7[%c0_21, %c0_22], %41 {strides = array<i32>} : memref<2x32xf32, #tpu.memory_space<vmem>>, vector<2x32xf32>,
    %c0_23 = arith.constant 0 : index
    %c0_24 = arith.constant 0 : index
    %c0_25 = arith.constant 0 : index
    %46 = vector.load %arg4[%c0_23, %c0_24, %c0_25] : memref<4x2x32xf32, #tpu.memory_space<vmem>>, vector<1x2x32xf32>
    %47 = vector.shape_cast %46 : vector<1x2x32xf32> to vector<2x32xf32>
    %48 = vector.shape_cast %43 : vector<2x32xf32> to vector<1x2x32xf32>
    tpu.vector_store %arg4[%c0_23, %c0_24, %c0_25], %48 {strides = array<i32>} : memref<4x2x32xf32, #tpu.memory_space<vmem>>, vector<1x2x32xf32>,
    %c3 = arith.constant 3 : index
    %c0_26 = arith.constant 0 : index
    %c0_27 = arith.constant 0 : index
    %49 = vector.load %arg2[%c3, %c0_26, %c0_27] : memref<4x2x128xbf16, #tpu.memory_space<vmem>>, vector<1x2x128xbf16>
    %50 = vector.shape_cast %49 : vector<1x2x128xbf16> to vector<2x128xbf16>
    %51 = arith.extf %50 : vector<2x128xbf16> to vector<2x128xf32>
    %c0_28 = arith.constant 0 : index
    %c0_29 = arith.constant 0 : index
    %52 = vector.load %arg8[%c0_28, %c0_29] : memref<2x32xf32, #tpu.memory_space<vmem>>, vector<2x32xf32>
    %53 = arith.truncf %52 : vector<2x32xf32> to vector<2x32xbf16>
    %c1 = arith.constant 1 : index
    %c0_30 = arith.constant 0 : index
    %c0_31 = arith.constant 0 : index
    %54 = vector.load %arg3[%c1, %c0_30, %c0_31] : memref<2x32x128xbf16, #tpu.memory_space<vmem>>, vector<1x32x128xbf16>
    %55 = vector.shape_cast %54 : vector<1x32x128xbf16> to vector<32x128xbf16>
    %cst_32 = arith.constant dense<0.000000e+00> : vector<2x128xf32>
    %56 = tpu.matmul %53, %55, %cst_32 {dimension_numbers = #tpu.dot_dimension_numbers<[1], [0], [0], [1], [0, 0, 1, 1], [], []>} : vector<2x32xbf16>, vector<32x128xbf16>, vector<2x128xf32> -> vector<2x128xf32>
    %57 = arith.addf %51, %56 : vector<2x128xf32>
    %c0_33 = arith.constant 0 : index
    %c0_34 = arith.constant 0 : index
    %58 = vector.load %arg9[%c0_33, %c0_34] : memref<2x32xf32, #tpu.memory_space<vmem>>, vector<2x32xf32>
    %59 = vector.extract_strided_slice %57 {offsets = [0, 0], sizes = [2, 32], strides = [1, 1]} : vector<2x128xf32> to vector<2x32xf32>
    %cst_35 = arith.constant 5.000000e-01 : f32
    %60 = vector.broadcast %cst_35 : f32 to vector<2x32xf32>
    %61 = arith.mulf %60, %59 : vector<2x32xf32>
    %62 = math.tanh %61 : vector<2x32xf32>
    %cst_36 = arith.constant 1.000000e+00 : f32
    %63 = vector.broadcast %cst_36 : f32 to vector<2x32xf32>
    %64 = arith.addf %62, %63 : vector<2x32xf32>
    %cst_37 = arith.constant 5.000000e-01 : f32
    %65 = vector.broadcast %cst_37 : f32 to vector<2x32xf32>
    %66 = arith.mulf %65, %64 : vector<2x32xf32>
    %67 = vector.extract_strided_slice %57 {offsets = [0, 32], sizes = [2, 32], strides = [1, 1]} : vector<2x128xf32> to vector<2x32xf32>
    %cst_38 = arith.constant 5.000000e-01 : f32
    %68 = vector.broadcast %cst_38 : f32 to vector<2x32xf32>
    %69 = arith.mulf %68, %67 : vector<2x32xf32>
    %70 = math.tanh %69 : vector<2x32xf32>
    %cst_39 = arith.constant 1.000000e+00 : f32
    %71 = vector.broadcast %cst_39 : f32 to vector<2x32xf32>
    %72 = arith.addf %70, %71 : vector<2x32xf32>
    %cst_40 = arith.constant 5.000000e-01 : f32
    %73 = vector.broadcast %cst_40 : f32 to vector<2x32xf32>
    %74 = arith.mulf %73, %72 : vector<2x32xf32>
    %75 = vector.extract_strided_slice %57 {offsets = [0, 64], sizes = [2, 32], strides = [1, 1]} : vector<2x128xf32> to vector<2x32xf32>
    %76 = math.tanh %75 : vector<2x32xf32>
    %77 = vector.extract_strided_slice %57 {offsets = [0, 96], sizes = [2, 32], strides = [1, 1]} : vector<2x128xf32> to vector<2x32xf32>
    %cst_41 = arith.constant 5.000000e-01 : f32
    %78 = vector.broadcast %cst_41 : f32 to vector<2x32xf32>
    %79 = arith.mulf %78, %77 : vector<2x32xf32>
    %80 = math.tanh %79 : vector<2x32xf32>
    %cst_42 = arith.constant 1.000000e+00 : f32
    %81 = vector.broadcast %cst_42 : f32 to vector<2x32xf32>
    %82 = arith.addf %80, %81 : vector<2x32xf32>
    %cst_43 = arith.constant 5.000000e-01 : f32
    %83 = vector.broadcast %cst_43 : f32 to vector<2x32xf32>
    %84 = arith.mulf %83, %82 : vector<2x32xf32>
    %85 = arith.mulf %74, %58 : vector<2x32xf32>
    %86 = arith.mulf %66, %76 : vector<2x32xf32>
    %87 = arith.addf %85, %86 : vector<2x32xf32>
    %88 = math.tanh %87 : vector<2x32xf32>
    %89 = arith.mulf %84, %88 : vector<2x32xf32>
    %c0_44 = arith.constant 0 : index
    %c0_45 = arith.constant 0 : index
    %90 = vector.load %arg8[%c0_44, %c0_45] : memref<2x32xf32, #tpu.memory_space<vmem>>, vector<2x32xf32>
    tpu.vector_store %arg8[%c0_44, %c0_45], %89 {strides = array<i32>} : memref<2x32xf32, #tpu.memory_space<vmem>>, vector<2x32xf32>,
    %c0_46 = arith.constant 0 : index
    %c0_47 = arith.constant 0 : index
    %91 = vector.load %arg9[%c0_46, %c0_47] : memref<2x32xf32, #tpu.memory_space<vmem>>, vector<2x32xf32>
    tpu.vector_store %arg9[%c0_46, %c0_47], %87 {strides = array<i32>} : memref<2x32xf32, #tpu.memory_space<vmem>>, vector<2x32xf32>,
    %c3_48 = arith.constant 3 : index
    %c0_49 = arith.constant 0 : index
    %c0_50 = arith.constant 0 : index
    %92 = vector.load %arg5[%c3_48, %c0_49, %c0_50] : memref<4x2x32xf32, #tpu.memory_space<vmem>>, vector<1x2x32xf32>
    %93 = vector.shape_cast %92 : vector<1x2x32xf32> to vector<2x32xf32>
    %94 = vector.shape_cast %89 : vector<2x32xf32> to vector<1x2x32xf32>
    tpu.vector_store %arg5[%c3_48, %c0_49, %c0_50], %94 {strides = array<i32>} : memref<4x2x32xf32, #tpu.memory_space<vmem>>, vector<1x2x32xf32>,
    %c1_51 = arith.constant 1 : index
    %c0_52 = arith.constant 0 : index
    %c0_53 = arith.constant 0 : index
    %95 = vector.load %arg1[%c1_51, %c0_52, %c0_53] : memref<4x2x128xbf16, #tpu.memory_space<vmem>>, vector<1x2x128xbf16>
    %96 = vector.shape_cast %95 : vector<1x2x128xbf16> to vector<2x128xbf16>
    %97 = arith.extf %96 : vector<2x128xbf16> to vector<2x128xf32>
    %c0_54 = arith.constant 0 : index
    %c0_55 = arith.constant 0 : index
    %98 = vector.load %arg6[%c0_54, %c0_55] : memref<2x32xf32, #tpu.memory_space<vmem>>, vector<2x32xf32>
    %99 = arith.truncf %98 : vector<2x32xf32> to vector<2x32xbf16>
    %c0_56 = arith.constant 0 : index
    %c0_57 = arith.constant 0 : index
    %c0_58 = arith.constant 0 : index
    %100 = vector.load %arg3[%c0_56, %c0_57, %c0_58] : memref<2x32x128xbf16, #tpu.memory_space<vmem>>, vector<1x32x128xbf16>
    %101 = vector.shape_cast %100 : vector<1x32x128xbf16> to vector<32x128xbf16>
    %cst_59 = arith.constant dense<0.000000e+00> : vector<2x128xf32>
    %102 = tpu.matmul %99, %101, %cst_59 {dimension_numbers = #tpu.dot_dimension_numbers<[1], [0], [0], [1], [0, 0, 1, 1], [], []>} : vector<2x32xbf16>, vector<32x128xbf16>, vector<2x128xf32> -> vector<2x128xf32>
    %103 = arith.addf %97, %102 : vector<2x128xf32>
    %c0_60 = arith.constant 0 : index
    %c0_61 = arith.constant 0 : index
    %104 = vector.load %arg7[%c0_60, %c0_61] : memref<2x32xf32, #tpu.memory_space<vmem>>, vector<2x32xf32>
    %105 = vector.extract_strided_slice %103 {offsets = [0, 0], sizes = [2, 32], strides = [1, 1]} : vector<2x128xf32> to vector<2x32xf32>
    %cst_62 = arith.constant 5.000000e-01 : f32
    %106 = vector.broadcast %cst_62 : f32 to vector<2x32xf32>
    %107 = arith.mulf %106, %105 : vector<2x32xf32>
    %108 = math.tanh %107 : vector<2x32xf32>
    %cst_63 = arith.constant 1.000000e+00 : f32
    %109 = vector.broadcast %cst_63 : f32 to vector<2x32xf32>
    %110 = arith.addf %108, %109 : vector<2x32xf32>
    %cst_64 = arith.constant 5.000000e-01 : f32
    %111 = vector.broadcast %cst_64 : f32 to vector<2x32xf32>
    %112 = arith.mulf %111, %110 : vector<2x32xf32>
    %113 = vector.extract_strided_slice %103 {offsets = [0, 32], sizes = [2, 32], strides = [1, 1]} : vector<2x128xf32> to vector<2x32xf32>
    %cst_65 = arith.constant 5.000000e-01 : f32
    %114 = vector.broadcast %cst_65 : f32 to vector<2x32xf32>
    %115 = arith.mulf %114, %113 : vector<2x32xf32>
    %116 = math.tanh %115 : vector<2x32xf32>
    %cst_66 = arith.constant 1.000000e+00 : f32
    %117 = vector.broadcast %cst_66 : f32 to vector<2x32xf32>
    %118 = arith.addf %116, %117 : vector<2x32xf32>
    %cst_67 = arith.constant 5.000000e-01 : f32
    %119 = vector.broadcast %cst_67 : f32 to vector<2x32xf32>
    %120 = arith.mulf %119, %118 : vector<2x32xf32>
    %121 = vector.extract_strided_slice %103 {offsets = [0, 64], sizes = [2, 32], strides = [1, 1]} : vector<2x128xf32> to vector<2x32xf32>
    %122 = math.tanh %121 : vector<2x32xf32>
    %123 = vector.extract_strided_slice %103 {offsets = [0, 96], sizes = [2, 32], strides = [1, 1]} : vector<2x128xf32> to vector<2x32xf32>
    %cst_68 = arith.constant 5.000000e-01 : f32
    %124 = vector.broadcast %cst_68 : f32 to vector<2x32xf32>
    %125 = arith.mulf %124, %123 : vector<2x32xf32>
    %126 = math.tanh %125 : vector<2x32xf32>
    %cst_69 = arith.constant 1.000000e+00 : f32
    %127 = vector.broadcast %cst_69 : f32 to vector<2x32xf32>
    %128 = arith.addf %126, %127 : vector<2x32xf32>
    %cst_70 = arith.constant 5.000000e-01 : f32
    %129 = vector.broadcast %cst_70 : f32 to vector<2x32xf32>
    %130 = arith.mulf %129, %128 : vector<2x32xf32>
    %131 = arith.mulf %120, %104 : vector<2x32xf32>
    %132 = arith.mulf %112, %122 : vector<2x32xf32>
    %133 = arith.addf %131, %132 : vector<2x32xf32>
    %134 = math.tanh %133 : vector<2x32xf32>
    %135 = arith.mulf %130, %134 : vector<2x32xf32>
    %c0_71 = arith.constant 0 : index
    %c0_72 = arith.constant 0 : index
    %136 = vector.load %arg6[%c0_71, %c0_72] : memref<2x32xf32, #tpu.memory_space<vmem>>, vector<2x32xf32>
    tpu.vector_store %arg6[%c0_71, %c0_72], %135 {strides = array<i32>} : memref<2x32xf32, #tpu.memory_space<vmem>>, vector<2x32xf32>,
    %c0_73 = arith.constant 0 : index
    %c0_74 = arith.constant 0 : index
    %137 = vector.load %arg7[%c0_73, %c0_74] : memref<2x32xf32, #tpu.memory_space<vmem>>, vector<2x32xf32>
    tpu.vector_store %arg7[%c0_73, %c0_74], %133 {strides = array<i32>} : memref<2x32xf32, #tpu.memory_space<vmem>>, vector<2x32xf32>,
    %c1_75 = arith.constant 1 : index
    %c0_76 = arith.constant 0 : index
    %c0_77 = arith.constant 0 : index
    %138 = vector.load %arg4[%c1_75, %c0_76, %c0_77] : memref<4x2x32xf32, #tpu.memory_space<vmem>>, vector<1x2x32xf32>
    %139 = vector.shape_cast %138 : vector<1x2x32xf32> to vector<2x32xf32>
    %140 = vector.shape_cast %135 : vector<2x32xf32> to vector<1x2x32xf32>
    tpu.vector_store %arg4[%c1_75, %c0_76, %c0_77], %140 {strides = array<i32>} : memref<4x2x32xf32, #tpu.memory_space<vmem>>, vector<1x2x32xf32>,
    %c2 = arith.constant 2 : index
    %c0_78 = arith.constant 0 : index
    %c0_79 = arith.constant 0 : index
    %141 = vector.load %arg2[%c2, %c0_78, %c0_79] : memref<4x2x128xbf16, #tpu.memory_space<vmem>>, vector<1x2x128xbf16>
    %142 = vector.shape_cast %141 : vector<1x2x128xbf16> to vector<2x128xbf16>
    %143 = arith.extf %142 : vector<2x128xbf16> to vector<2x128xf32>
    %c0_80 = arith.constant 0 : index
    %c0_81 = arith.constant 0 : index
    %144 = vector.load %arg8[%c0_80, %c0_81] : memref<2x32xf32, #tpu.memory_space<vmem>>, vector<2x32xf32>
    %145 = arith.truncf %144 : vector<2x32xf32> to vector<2x32xbf16>
    %c1_82 = arith.constant 1 : index
    %c0_83 = arith.constant 0 : index
    %c0_84 = arith.constant 0 : index
    %146 = vector.load %arg3[%c1_82, %c0_83, %c0_84] : memref<2x32x128xbf16, #tpu.memory_space<vmem>>, vector<1x32x128xbf16>
    %147 = vector.shape_cast %146 : vector<1x32x128xbf16> to vector<32x128xbf16>
    %cst_85 = arith.constant dense<0.000000e+00> : vector<2x128xf32>
    %148 = tpu.matmul %145, %147, %cst_85 {dimension_numbers = #tpu.dot_dimension_numbers<[1], [0], [0], [1], [0, 0, 1, 1], [], []>} : vector<2x32xbf16>, vector<32x128xbf16>, vector<2x128xf32> -> vector<2x128xf32>
    %149 = arith.addf %143, %148 : vector<2x128xf32>
    %c0_86 = arith.constant 0 : index
    %c0_87 = arith.constant 0 : index
    %150 = vector.load %arg9[%c0_86, %c0_87] : memref<2x32xf32, #tpu.memory_space<vmem>>, vector<2x32xf32>
    %151 = vector.extract_strided_slice %149 {offsets = [0, 0], sizes = [2, 32], strides = [1, 1]} : vector<2x128xf32> to vector<2x32xf32>
    %cst_88 = arith.constant 5.000000e-01 : f32
    %152 = vector.broadcast %cst_88 : f32 to vector<2x32xf32>
    %153 = arith.mulf %152, %151 : vector<2x32xf32>
    %154 = math.tanh %153 : vector<2x32xf32>
    %cst_89 = arith.constant 1.000000e+00 : f32
    %155 = vector.broadcast %cst_89 : f32 to vector<2x32xf32>
    %156 = arith.addf %154, %155 : vector<2x32xf32>
    %cst_90 = arith.constant 5.000000e-01 : f32
    %157 = vector.broadcast %cst_90 : f32 to vector<2x32xf32>
    %158 = arith.mulf %157, %156 : vector<2x32xf32>
    %159 = vector.extract_strided_slice %149 {offsets = [0, 32], sizes = [2, 32], strides = [1, 1]} : vector<2x128xf32> to vector<2x32xf32>
    %cst_91 = arith.constant 5.000000e-01 : f32
    %160 = vector.broadcast %cst_91 : f32 to vector<2x32xf32>
    %161 = arith.mulf %160, %159 : vector<2x32xf32>
    %162 = math.tanh %161 : vector<2x32xf32>
    %cst_92 = arith.constant 1.000000e+00 : f32
    %163 = vector.broadcast %cst_92 : f32 to vector<2x32xf32>
    %164 = arith.addf %162, %163 : vector<2x32xf32>
    %cst_93 = arith.constant 5.000000e-01 : f32
    %165 = vector.broadcast %cst_93 : f32 to vector<2x32xf32>
    %166 = arith.mulf %165, %164 : vector<2x32xf32>
    %167 = vector.extract_strided_slice %149 {offsets = [0, 64], sizes = [2, 32], strides = [1, 1]} : vector<2x128xf32> to vector<2x32xf32>
    %168 = math.tanh %167 : vector<2x32xf32>
    %169 = vector.extract_strided_slice %149 {offsets = [0, 96], sizes = [2, 32], strides = [1, 1]} : vector<2x128xf32> to vector<2x32xf32>
    %cst_94 = arith.constant 5.000000e-01 : f32
    %170 = vector.broadcast %cst_94 : f32 to vector<2x32xf32>
    %171 = arith.mulf %170, %169 : vector<2x32xf32>
    %172 = math.tanh %171 : vector<2x32xf32>
    %cst_95 = arith.constant 1.000000e+00 : f32
    %173 = vector.broadcast %cst_95 : f32 to vector<2x32xf32>
    %174 = arith.addf %172, %173 : vector<2x32xf32>
    %cst_96 = arith.constant 5.000000e-01 : f32
    %175 = vector.broadcast %cst_96 : f32 to vector<2x32xf32>
    %176 = arith.mulf %175, %174 : vector<2x32xf32>
    %177 = arith.mulf %166, %150 : vector<2x32xf32>
    %178 = arith.mulf %158, %168 : vector<2x32xf32>
    %179 = arith.addf %177, %178 : vector<2x32xf32>
    %180 = math.tanh %179 : vector<2x32xf32>
    %181 = arith.mulf %176, %180 : vector<2x32xf32>
    %c0_97 = arith.constant 0 : index
    %c0_98 = arith.constant 0 : index
    %182 = vector.load %arg8[%c0_97, %c0_98] : memref<2x32xf32, #tpu.memory_space<vmem>>, vector<2x32xf32>
    tpu.vector_store %arg8[%c0_97, %c0_98], %181 {strides = array<i32>} : memref<2x32xf32, #tpu.memory_space<vmem>>, vector<2x32xf32>,
    %c0_99 = arith.constant 0 : index
    %c0_100 = arith.constant 0 : index
    %183 = vector.load %arg9[%c0_99, %c0_100] : memref<2x32xf32, #tpu.memory_space<vmem>>, vector<2x32xf32>
    tpu.vector_store %arg9[%c0_99, %c0_100], %179 {strides = array<i32>} : memref<2x32xf32, #tpu.memory_space<vmem>>, vector<2x32xf32>,
    %c2_101 = arith.constant 2 : index
    %c0_102 = arith.constant 0 : index
    %c0_103 = arith.constant 0 : index
    %184 = vector.load %arg5[%c2_101, %c0_102, %c0_103] : memref<4x2x32xf32, #tpu.memory_space<vmem>>, vector<1x2x32xf32>
    %185 = vector.shape_cast %184 : vector<1x2x32xf32> to vector<2x32xf32>
    %186 = vector.shape_cast %181 : vector<2x32xf32> to vector<1x2x32xf32>
    tpu.vector_store %arg5[%c2_101, %c0_102, %c0_103], %186 {strides = array<i32>} : memref<4x2x32xf32, #tpu.memory_space<vmem>>, vector<1x2x32xf32>,
    %c2_104 = arith.constant 2 : index
    %c0_105 = arith.constant 0 : index
    %c0_106 = arith.constant 0 : index
    %187 = vector.load %arg1[%c2_104, %c0_105, %c0_106] : memref<4x2x128xbf16, #tpu.memory_space<vmem>>, vector<1x2x128xbf16>
    %188 = vector.shape_cast %187 : vector<1x2x128xbf16> to vector<2x128xbf16>
    %189 = arith.extf %188 : vector<2x128xbf16> to vector<2x128xf32>
    %c0_107 = arith.constant 0 : index
    %c0_108 = arith.constant 0 : index
    %190 = vector.load %arg6[%c0_107, %c0_108] : memref<2x32xf32, #tpu.memory_space<vmem>>, vector<2x32xf32>
    %191 = arith.truncf %190 : vector<2x32xf32> to vector<2x32xbf16>
    %c0_109 = arith.constant 0 : index
    %c0_110 = arith.constant 0 : index
    %c0_111 = arith.constant 0 : index
    %192 = vector.load %arg3[%c0_109, %c0_110, %c0_111] : memref<2x32x128xbf16, #tpu.memory_space<vmem>>, vector<1x32x128xbf16>
    %193 = vector.shape_cast %192 : vector<1x32x128xbf16> to vector<32x128xbf16>
    %cst_112 = arith.constant dense<0.000000e+00> : vector<2x128xf32>
    %194 = tpu.matmul %191, %193, %cst_112 {dimension_numbers = #tpu.dot_dimension_numbers<[1], [0], [0], [1], [0, 0, 1, 1], [], []>} : vector<2x32xbf16>, vector<32x128xbf16>, vector<2x128xf32> -> vector<2x128xf32>
    %195 = arith.addf %189, %194 : vector<2x128xf32>
    %c0_113 = arith.constant 0 : index
    %c0_114 = arith.constant 0 : index
    %196 = vector.load %arg7[%c0_113, %c0_114] : memref<2x32xf32, #tpu.memory_space<vmem>>, vector<2x32xf32>
    %197 = vector.extract_strided_slice %195 {offsets = [0, 0], sizes = [2, 32], strides = [1, 1]} : vector<2x128xf32> to vector<2x32xf32>
    %cst_115 = arith.constant 5.000000e-01 : f32
    %198 = vector.broadcast %cst_115 : f32 to vector<2x32xf32>
    %199 = arith.mulf %198, %197 : vector<2x32xf32>
    %200 = math.tanh %199 : vector<2x32xf32>
    %cst_116 = arith.constant 1.000000e+00 : f32
    %201 = vector.broadcast %cst_116 : f32 to vector<2x32xf32>
    %202 = arith.addf %200, %201 : vector<2x32xf32>
    %cst_117 = arith.constant 5.000000e-01 : f32
    %203 = vector.broadcast %cst_117 : f32 to vector<2x32xf32>
    %204 = arith.mulf %203, %202 : vector<2x32xf32>
    %205 = vector.extract_strided_slice %195 {offsets = [0, 32], sizes = [2, 32], strides = [1, 1]} : vector<2x128xf32> to vector<2x32xf32>
    %cst_118 = arith.constant 5.000000e-01 : f32
    %206 = vector.broadcast %cst_118 : f32 to vector<2x32xf32>
    %207 = arith.mulf %206, %205 : vector<2x32xf32>
    %208 = math.tanh %207 : vector<2x32xf32>
    %cst_119 = arith.constant 1.000000e+00 : f32
    %209 = vector.broadcast %cst_119 : f32 to vector<2x32xf32>
    %210 = arith.addf %208, %209 : vector<2x32xf32>
    %cst_120 = arith.constant 5.000000e-01 : f32
    %211 = vector.broadcast %cst_120 : f32 to vector<2x32xf32>
    %212 = arith.mulf %211, %210 : vector<2x32xf32>
    %213 = vector.extract_strided_slice %195 {offsets = [0, 64], sizes = [2, 32], strides = [1, 1]} : vector<2x128xf32> to vector<2x32xf32>
    %214 = math.tanh %213 : vector<2x32xf32>
    %215 = vector.extract_strided_slice %195 {offsets = [0, 96], sizes = [2, 32], strides = [1, 1]} : vector<2x128xf32> to vector<2x32xf32>
    %cst_121 = arith.constant 5.000000e-01 : f32
    %216 = vector.broadcast %cst_121 : f32 to vector<2x32xf32>
    %217 = arith.mulf %216, %215 : vector<2x32xf32>
    %218 = math.tanh %217 : vector<2x32xf32>
    %cst_122 = arith.constant 1.000000e+00 : f32
    %219 = vector.broadcast %cst_122 : f32 to vector<2x32xf32>
    %220 = arith.addf %218, %219 : vector<2x32xf32>
    %cst_123 = arith.constant 5.000000e-01 : f32
    %221 = vector.broadcast %cst_123 : f32 to vector<2x32xf32>
    %222 = arith.mulf %221, %220 : vector<2x32xf32>
    %223 = arith.mulf %212, %196 : vector<2x32xf32>
    %224 = arith.mulf %204, %214 : vector<2x32xf32>
    %225 = arith.addf %223, %224 : vector<2x32xf32>
    %226 = math.tanh %225 : vector<2x32xf32>
    %227 = arith.mulf %222, %226 : vector<2x32xf32>
    %c0_124 = arith.constant 0 : index
    %c0_125 = arith.constant 0 : index
    %228 = vector.load %arg6[%c0_124, %c0_125] : memref<2x32xf32, #tpu.memory_space<vmem>>, vector<2x32xf32>
    tpu.vector_store %arg6[%c0_124, %c0_125], %227 {strides = array<i32>} : memref<2x32xf32, #tpu.memory_space<vmem>>, vector<2x32xf32>,
    %c0_126 = arith.constant 0 : index
    %c0_127 = arith.constant 0 : index
    %229 = vector.load %arg7[%c0_126, %c0_127] : memref<2x32xf32, #tpu.memory_space<vmem>>, vector<2x32xf32>
    tpu.vector_store %arg7[%c0_126, %c0_127], %225 {strides = array<i32>} : memref<2x32xf32, #tpu.memory_space<vmem>>, vector<2x32xf32>,
    %c2_128 = arith.constant 2 : index
    %c0_129 = arith.constant 0 : index
    %c0_130 = arith.constant 0 : index
    %230 = vector.load %arg4[%c2_128, %c0_129, %c0_130] : memref<4x2x32xf32, #tpu.memory_space<vmem>>, vector<1x2x32xf32>
    %231 = vector.shape_cast %230 : vector<1x2x32xf32> to vector<2x32xf32>
    %232 = vector.shape_cast %227 : vector<2x32xf32> to vector<1x2x32xf32>
    tpu.vector_store %arg4[%c2_128, %c0_129, %c0_130], %232 {strides = array<i32>} : memref<4x2x32xf32, #tpu.memory_space<vmem>>, vector<1x2x32xf32>,
    %c1_131 = arith.constant 1 : index
    %c0_132 = arith.constant 0 : index
    %c0_133 = arith.constant 0 : index
    %233 = vector.load %arg2[%c1_131, %c0_132, %c0_133] : memref<4x2x128xbf16, #tpu.memory_space<vmem>>, vector<1x2x128xbf16>
    %234 = vector.shape_cast %233 : vector<1x2x128xbf16> to vector<2x128xbf16>
    %235 = arith.extf %234 : vector<2x128xbf16> to vector<2x128xf32>
    %c0_134 = arith.constant 0 : index
    %c0_135 = arith.constant 0 : index
    %236 = vector.load %arg8[%c0_134, %c0_135] : memref<2x32xf32, #tpu.memory_space<vmem>>, vector<2x32xf32>
    %237 = arith.truncf %236 : vector<2x32xf32> to vector<2x32xbf16>
    %c1_136 = arith.constant 1 : index
    %c0_137 = arith.constant 0 : index
    %c0_138 = arith.constant 0 : index
    %238 = vector.load %arg3[%c1_136, %c0_137, %c0_138] : memref<2x32x128xbf16, #tpu.memory_space<vmem>>, vector<1x32x128xbf16>
    %239 = vector.shape_cast %238 : vector<1x32x128xbf16> to vector<32x128xbf16>
    %cst_139 = arith.constant dense<0.000000e+00> : vector<2x128xf32>
    %240 = tpu.matmul %237, %239, %cst_139 {dimension_numbers = #tpu.dot_dimension_numbers<[1], [0], [0], [1], [0, 0, 1, 1], [], []>} : vector<2x32xbf16>, vector<32x128xbf16>, vector<2x128xf32> -> vector<2x128xf32>
    %241 = arith.addf %235, %240 : vector<2x128xf32>
    %c0_140 = arith.constant 0 : index
    %c0_141 = arith.constant 0 : index
    %242 = vector.load %arg9[%c0_140, %c0_141] : memref<2x32xf32, #tpu.memory_space<vmem>>, vector<2x32xf32>
    %243 = vector.extract_strided_slice %241 {offsets = [0, 0], sizes = [2, 32], strides = [1, 1]} : vector<2x128xf32> to vector<2x32xf32>
    %cst_142 = arith.constant 5.000000e-01 : f32
    %244 = vector.broadcast %cst_142 : f32 to vector<2x32xf32>
    %245 = arith.mulf %244, %243 : vector<2x32xf32>
    %246 = math.tanh %245 : vector<2x32xf32>
    %cst_143 = arith.constant 1.000000e+00 : f32
    %247 = vector.broadcast %cst_143 : f32 to vector<2x32xf32>
    %248 = arith.addf %246, %247 : vector<2x32xf32>
    %cst_144 = arith.constant 5.000000e-01 : f32
    %249 = vector.broadcast %cst_144 : f32 to vector<2x32xf32>
    %250 = arith.mulf %249, %248 : vector<2x32xf32>
    %251 = vector.extract_strided_slice %241 {offsets = [0, 32], sizes = [2, 32], strides = [1, 1]} : vector<2x128xf32> to vector<2x32xf32>
    %cst_145 = arith.constant 5.000000e-01 : f32
    %252 = vector.broadcast %cst_145 : f32 to vector<2x32xf32>
    %253 = arith.mulf %252, %251 : vector<2x32xf32>
    %254 = math.tanh %253 : vector<2x32xf32>
    %cst_146 = arith.constant 1.000000e+00 : f32
    %255 = vector.broadcast %cst_146 : f32 to vector<2x32xf32>
    %256 = arith.addf %254, %255 : vector<2x32xf32>
    %cst_147 = arith.constant 5.000000e-01 : f32
    %257 = vector.broadcast %cst_147 : f32 to vector<2x32xf32>
    %258 = arith.mulf %257, %256 : vector<2x32xf32>
    %259 = vector.extract_strided_slice %241 {offsets = [0, 64], sizes = [2, 32], strides = [1, 1]} : vector<2x128xf32> to vector<2x32xf32>
    %260 = math.tanh %259 : vector<2x32xf32>
    %261 = vector.extract_strided_slice %241 {offsets = [0, 96], sizes = [2, 32], strides = [1, 1]} : vector<2x128xf32> to vector<2x32xf32>
    %cst_148 = arith.constant 5.000000e-01 : f32
    %262 = vector.broadcast %cst_148 : f32 to vector<2x32xf32>
    %263 = arith.mulf %262, %261 : vector<2x32xf32>
    %264 = math.tanh %263 : vector<2x32xf32>
    %cst_149 = arith.constant 1.000000e+00 : f32
    %265 = vector.broadcast %cst_149 : f32 to vector<2x32xf32>
    %266 = arith.addf %264, %265 : vector<2x32xf32>
    %cst_150 = arith.constant 5.000000e-01 : f32
    %267 = vector.broadcast %cst_150 : f32 to vector<2x32xf32>
    %268 = arith.mulf %267, %266 : vector<2x32xf32>
    %269 = arith.mulf %258, %242 : vector<2x32xf32>
    %270 = arith.mulf %250, %260 : vector<2x32xf32>
    %271 = arith.addf %269, %270 : vector<2x32xf32>
    %272 = math.tanh %271 : vector<2x32xf32>
    %273 = arith.mulf %268, %272 : vector<2x32xf32>
    %c0_151 = arith.constant 0 : index
    %c0_152 = arith.constant 0 : index
    %274 = vector.load %arg8[%c0_151, %c0_152] : memref<2x32xf32, #tpu.memory_space<vmem>>, vector<2x32xf32>
    tpu.vector_store %arg8[%c0_151, %c0_152], %273 {strides = array<i32>} : memref<2x32xf32, #tpu.memory_space<vmem>>, vector<2x32xf32>,
    %c0_153 = arith.constant 0 : index
    %c0_154 = arith.constant 0 : index
    %275 = vector.load %arg9[%c0_153, %c0_154] : memref<2x32xf32, #tpu.memory_space<vmem>>, vector<2x32xf32>
    tpu.vector_store %arg9[%c0_153, %c0_154], %271 {strides = array<i32>} : memref<2x32xf32, #tpu.memory_space<vmem>>, vector<2x32xf32>,
    %c1_155 = arith.constant 1 : index
    %c0_156 = arith.constant 0 : index
    %c0_157 = arith.constant 0 : index
    %276 = vector.load %arg5[%c1_155, %c0_156, %c0_157] : memref<4x2x32xf32, #tpu.memory_space<vmem>>, vector<1x2x32xf32>
    %277 = vector.shape_cast %276 : vector<1x2x32xf32> to vector<2x32xf32>
    %278 = vector.shape_cast %273 : vector<2x32xf32> to vector<1x2x32xf32>
    tpu.vector_store %arg5[%c1_155, %c0_156, %c0_157], %278 {strides = array<i32>} : memref<4x2x32xf32, #tpu.memory_space<vmem>>, vector<1x2x32xf32>,
    %c3_158 = arith.constant 3 : index
    %c0_159 = arith.constant 0 : index
    %c0_160 = arith.constant 0 : index
    %279 = vector.load %arg1[%c3_158, %c0_159, %c0_160] : memref<4x2x128xbf16, #tpu.memory_space<vmem>>, vector<1x2x128xbf16>
    %280 = vector.shape_cast %279 : vector<1x2x128xbf16> to vector<2x128xbf16>
    %281 = arith.extf %280 : vector<2x128xbf16> to vector<2x128xf32>
    %c0_161 = arith.constant 0 : index
    %c0_162 = arith.constant 0 : index
    %282 = vector.load %arg6[%c0_161, %c0_162] : memref<2x32xf32, #tpu.memory_space<vmem>>, vector<2x32xf32>
    %283 = arith.truncf %282 : vector<2x32xf32> to vector<2x32xbf16>
    %c0_163 = arith.constant 0 : index
    %c0_164 = arith.constant 0 : index
    %c0_165 = arith.constant 0 : index
    %284 = vector.load %arg3[%c0_163, %c0_164, %c0_165] : memref<2x32x128xbf16, #tpu.memory_space<vmem>>, vector<1x32x128xbf16>
    %285 = vector.shape_cast %284 : vector<1x32x128xbf16> to vector<32x128xbf16>
    %cst_166 = arith.constant dense<0.000000e+00> : vector<2x128xf32>
    %286 = tpu.matmul %283, %285, %cst_166 {dimension_numbers = #tpu.dot_dimension_numbers<[1], [0], [0], [1], [0, 0, 1, 1], [], []>} : vector<2x32xbf16>, vector<32x128xbf16>, vector<2x128xf32> -> vector<2x128xf32>
    %287 = arith.addf %281, %286 : vector<2x128xf32>
    %c0_167 = arith.constant 0 : index
    %c0_168 = arith.constant 0 : index
    %288 = vector.load %arg7[%c0_167, %c0_168] : memref<2x32xf32, #tpu.memory_space<vmem>>, vector<2x32xf32>
    %289 = vector.extract_strided_slice %287 {offsets = [0, 0], sizes = [2, 32], strides = [1, 1]} : vector<2x128xf32> to vector<2x32xf32>
    %cst_169 = arith.constant 5.000000e-01 : f32
    %290 = vector.broadcast %cst_169 : f32 to vector<2x32xf32>
    %291 = arith.mulf %290, %289 : vector<2x32xf32>
    %292 = math.tanh %291 : vector<2x32xf32>
    %cst_170 = arith.constant 1.000000e+00 : f32
    %293 = vector.broadcast %cst_170 : f32 to vector<2x32xf32>
    %294 = arith.addf %292, %293 : vector<2x32xf32>
    %cst_171 = arith.constant 5.000000e-01 : f32
    %295 = vector.broadcast %cst_171 : f32 to vector<2x32xf32>
    %296 = arith.mulf %295, %294 : vector<2x32xf32>
    %297 = vector.extract_strided_slice %287 {offsets = [0, 32], sizes = [2, 32], strides = [1, 1]} : vector<2x128xf32> to vector<2x32xf32>
    %cst_172 = arith.constant 5.000000e-01 : f32
    %298 = vector.broadcast %cst_172 : f32 to vector<2x32xf32>
    %299 = arith.mulf %298, %297 : vector<2x32xf32>
    %300 = math.tanh %299 : vector<2x32xf32>
    %cst_173 = arith.constant 1.000000e+00 : f32
    %301 = vector.broadcast %cst_173 : f32 to vector<2x32xf32>
    %302 = arith.addf %300, %301 : vector<2x32xf32>
    %cst_174 = arith.constant 5.000000e-01 : f32
    %303 = vector.broadcast %cst_174 : f32 to vector<2x32xf32>
    %304 = arith.mulf %303, %302 : vector<2x32xf32>
    %305 = vector.extract_strided_slice %287 {offsets = [0, 64], sizes = [2, 32], strides = [1, 1]} : vector<2x128xf32> to vector<2x32xf32>
    %306 = math.tanh %305 : vector<2x32xf32>
    %307 = vector.extract_strided_slice %287 {offsets = [0, 96], sizes = [2, 32], strides = [1, 1]} : vector<2x128xf32> to vector<2x32xf32>
    %cst_175 = arith.constant 5.000000e-01 : f32
    %308 = vector.broadcast %cst_175 : f32 to vector<2x32xf32>
    %309 = arith.mulf %308, %307 : vector<2x32xf32>
    %310 = math.tanh %309 : vector<2x32xf32>
    %cst_176 = arith.constant 1.000000e+00 : f32
    %311 = vector.broadcast %cst_176 : f32 to vector<2x32xf32>
    %312 = arith.addf %310, %311 : vector<2x32xf32>
    %cst_177 = arith.constant 5.000000e-01 : f32
    %313 = vector.broadcast %cst_177 : f32 to vector<2x32xf32>
    %314 = arith.mulf %313, %312 : vector<2x32xf32>
    %315 = arith.mulf %304, %288 : vector<2x32xf32>
    %316 = arith.mulf %296, %306 : vector<2x32xf32>
    %317 = arith.addf %315, %316 : vector<2x32xf32>
    %318 = math.tanh %317 : vector<2x32xf32>
    %319 = arith.mulf %314, %318 : vector<2x32xf32>
    %c0_178 = arith.constant 0 : index
    %c0_179 = arith.constant 0 : index
    %320 = vector.load %arg6[%c0_178, %c0_179] : memref<2x32xf32, #tpu.memory_space<vmem>>, vector<2x32xf32>
    tpu.vector_store %arg6[%c0_178, %c0_179], %319 {strides = array<i32>} : memref<2x32xf32, #tpu.memory_space<vmem>>, vector<2x32xf32>,
    %c0_180 = arith.constant 0 : index
    %c0_181 = arith.constant 0 : index
    %321 = vector.load %arg7[%c0_180, %c0_181] : memref<2x32xf32, #tpu.memory_space<vmem>>, vector<2x32xf32>
    tpu.vector_store %arg7[%c0_180, %c0_181], %317 {strides = array<i32>} : memref<2x32xf32, #tpu.memory_space<vmem>>, vector<2x32xf32>,
    %c3_182 = arith.constant 3 : index
    %c0_183 = arith.constant 0 : index
    %c0_184 = arith.constant 0 : index
    %322 = vector.load %arg4[%c3_182, %c0_183, %c0_184] : memref<4x2x32xf32, #tpu.memory_space<vmem>>, vector<1x2x32xf32>
    %323 = vector.shape_cast %322 : vector<1x2x32xf32> to vector<2x32xf32>
    %324 = vector.shape_cast %319 : vector<2x32xf32> to vector<1x2x32xf32>
    tpu.vector_store %arg4[%c3_182, %c0_183, %c0_184], %324 {strides = array<i32>} : memref<4x2x32xf32, #tpu.memory_space<vmem>>, vector<1x2x32xf32>,
    %c0_185 = arith.constant 0 : index
    %c0_186 = arith.constant 0 : index
    %c0_187 = arith.constant 0 : index
    %325 = vector.load %arg2[%c0_185, %c0_186, %c0_187] : memref<4x2x128xbf16, #tpu.memory_space<vmem>>, vector<1x2x128xbf16>
    %326 = vector.shape_cast %325 : vector<1x2x128xbf16> to vector<2x128xbf16>
    %327 = arith.extf %326 : vector<2x128xbf16> to vector<2x128xf32>
    %c0_188 = arith.constant 0 : index
    %c0_189 = arith.constant 0 : index
    %328 = vector.load %arg8[%c0_188, %c0_189] : memref<2x32xf32, #tpu.memory_space<vmem>>, vector<2x32xf32>
    %329 = arith.truncf %328 : vector<2x32xf32> to vector<2x32xbf16>
    %c1_190 = arith.constant 1 : index
    %c0_191 = arith.constant 0 : index
    %c0_192 = arith.constant 0 : index
    %330 = vector.load %arg3[%c1_190, %c0_191, %c0_192] : memref<2x32x128xbf16, #tpu.memory_space<vmem>>, vector<1x32x128xbf16>
    %331 = vector.shape_cast %330 : vector<1x32x128xbf16> to vector<32x128xbf16>
    %cst_193 = arith.constant dense<0.000000e+00> : vector<2x128xf32>
    %332 = tpu.matmul %329, %331, %cst_193 {dimension_numbers = #tpu.dot_dimension_numbers<[1], [0], [0], [1], [0, 0, 1, 1], [], []>} : vector<2x32xbf16>, vector<32x128xbf16>, vector<2x128xf32> -> vector<2x128xf32>
    %333 = arith.addf %327, %332 : vector<2x128xf32>
    %c0_194 = arith.constant 0 : index
    %c0_195 = arith.constant 0 : index
    %334 = vector.load %arg9[%c0_194, %c0_195] : memref<2x32xf32, #tpu.memory_space<vmem>>, vector<2x32xf32>
    %335 = vector.extract_strided_slice %333 {offsets = [0, 0], sizes = [2, 32], strides = [1, 1]} : vector<2x128xf32> to vector<2x32xf32>
    %cst_196 = arith.constant 5.000000e-01 : f32
    %336 = vector.broadcast %cst_196 : f32 to vector<2x32xf32>
    %337 = arith.mulf %336, %335 : vector<2x32xf32>
    %338 = math.tanh %337 : vector<2x32xf32>
    %cst_197 = arith.constant 1.000000e+00 : f32
    %339 = vector.broadcast %cst_197 : f32 to vector<2x32xf32>
    %340 = arith.addf %338, %339 : vector<2x32xf32>
    %cst_198 = arith.constant 5.000000e-01 : f32
    %341 = vector.broadcast %cst_198 : f32 to vector<2x32xf32>
    %342 = arith.mulf %341, %340 : vector<2x32xf32>
    %343 = vector.extract_strided_slice %333 {offsets = [0, 32], sizes = [2, 32], strides = [1, 1]} : vector<2x128xf32> to vector<2x32xf32>
    %cst_199 = arith.constant 5.000000e-01 : f32
    %344 = vector.broadcast %cst_199 : f32 to vector<2x32xf32>
    %345 = arith.mulf %344, %343 : vector<2x32xf32>
    %346 = math.tanh %345 : vector<2x32xf32>
    %cst_200 = arith.constant 1.000000e+00 : f32
    %347 = vector.broadcast %cst_200 : f32 to vector<2x32xf32>
    %348 = arith.addf %346, %347 : vector<2x32xf32>
    %cst_201 = arith.constant 5.000000e-01 : f32
    %349 = vector.broadcast %cst_201 : f32 to vector<2x32xf32>
    %350 = arith.mulf %349, %348 : vector<2x32xf32>
    %351 = vector.extract_strided_slice %333 {offsets = [0, 64], sizes = [2, 32], strides = [1, 1]} : vector<2x128xf32> to vector<2x32xf32>
    %352 = math.tanh %351 : vector<2x32xf32>
    %353 = vector.extract_strided_slice %333 {offsets = [0, 96], sizes = [2, 32], strides = [1, 1]} : vector<2x128xf32> to vector<2x32xf32>
    %cst_202 = arith.constant 5.000000e-01 : f32
    %354 = vector.broadcast %cst_202 : f32 to vector<2x32xf32>
    %355 = arith.mulf %354, %353 : vector<2x32xf32>
    %356 = math.tanh %355 : vector<2x32xf32>
    %cst_203 = arith.constant 1.000000e+00 : f32
    %357 = vector.broadcast %cst_203 : f32 to vector<2x32xf32>
    %358 = arith.addf %356, %357 : vector<2x32xf32>
    %cst_204 = arith.constant 5.000000e-01 : f32
    %359 = vector.broadcast %cst_204 : f32 to vector<2x32xf32>
    %360 = arith.mulf %359, %358 : vector<2x32xf32>
    %361 = arith.mulf %350, %334 : vector<2x32xf32>
    %362 = arith.mulf %342, %352 : vector<2x32xf32>
    %363 = arith.addf %361, %362 : vector<2x32xf32>
    %364 = math.tanh %363 : vector<2x32xf32>
    %365 = arith.mulf %360, %364 : vector<2x32xf32>
    %c0_205 = arith.constant 0 : index
    %c0_206 = arith.constant 0 : index
    %366 = vector.load %arg8[%c0_205, %c0_206] : memref<2x32xf32, #tpu.memory_space<vmem>>, vector<2x32xf32>
    tpu.vector_store %arg8[%c0_205, %c0_206], %365 {strides = array<i32>} : memref<2x32xf32, #tpu.memory_space<vmem>>, vector<2x32xf32>,
    %c0_207 = arith.constant 0 : index
    %c0_208 = arith.constant 0 : index
    %367 = vector.load %arg9[%c0_207, %c0_208] : memref<2x32xf32, #tpu.memory_space<vmem>>, vector<2x32xf32>
    tpu.vector_store %arg9[%c0_207, %c0_208], %363 {strides = array<i32>} : memref<2x32xf32, #tpu.memory_space<vmem>>, vector<2x32xf32>,
    %c0_209 = arith.constant 0 : index
    %c0_210 = arith.constant 0 : index
    %c0_211 = arith.constant 0 : index
    %368 = vector.load %arg5[%c0_209, %c0_210, %c0_211] : memref<4x2x32xf32, #tpu.memory_space<vmem>>, vector<1x2x32xf32>
    %369 = vector.shape_cast %368 : vector<1x2x32xf32> to vector<2x32xf32>
    %370 = vector.shape_cast %365 : vector<2x32xf32> to vector<1x2x32xf32>
    tpu.vector_store %arg5[%c0_209, %c0_210, %c0_211], %370 {strides = array<i32>} : memref<4x2x32xf32, #tpu.memory_space<vmem>>, vector<1x2x32xf32>,
    return
  }
  func.func @transform_0(%arg0: i32) -> (i32, i32, i32) {
    %c0_i32 = arith.constant 0 : i32
    %c0_i32_0 = arith.constant 0 : i32
    %c0_i32_1 = arith.constant 0 : i32
    return %arg0, %c0_i32, %c0_i32_0 : i32, i32, i32
  }
  func.func @transform_1(%arg0: i32) -> (i32, i32, i32) {
    %c1_i32 = arith.constant 1 : i32
    %0 = arith.subi %c1_i32, %arg0 : i32
    %c0_i32 = arith.constant 0 : i32
    %c0_i32_0 = arith.constant 0 : i32
    %c0_i32_1 = arith.constant 0 : i32
    return %0, %c0_i32, %c0_i32_0 : i32, i32, i32
  }
  func.func @transform_2(%arg0: i32) -> (i32, i32, i32) {
    %c0_i32 = arith.constant 0 : i32
    %c0_i32_0 = arith.constant 0 : i32
    %c0_i32_1 = arith.constant 0 : i32
    %c0_i32_2 = arith.constant 0 : i32
    return %c0_i32, %c0_i32_0, %c0_i32_1 : i32, i32, i32
  }
  func.func @transform_3(%arg0: i32) -> (i32, i32, i32) {
    %c0_i32 = arith.constant 0 : i32
    %c0_i32_0 = arith.constant 0 : i32
    %c0_i32_1 = arith.constant 0 : i32
    return %arg0, %c0_i32, %c0_i32_0 : i32, i32, i32
  }
  func.func @transform_4(%arg0: i32) -> (i32, i32, i32) {
    %c1_i32 = arith.constant 1 : i32
    %0 = arith.subi %c1_i32, %arg0 : i32
    %c0_i32 = arith.constant 0 : i32
    %c0_i32_0 = arith.constant 0 : i32
    %c0_i32_1 = arith.constant 0 : i32
    return %0, %c0_i32, %c0_i32_0 : i32, i32, i32
  }
}

</mosaic_0001>

<bundles_post_ra>
// kernel: tpu_custom_call.1
= control target key start
LH: loop header
LB: loop body
LE: loop exit
PB: predicated region body
PF: predicated region fallthrough
CT: control target
= control target key end

     0   :  { %s2596_s0 = inlined_call_operand.hbm [shape: bf16[8,2,128], index: 0, kind: input, shape index: {}]   ;;  %s2597_s1 = inlined_call_operand.hbm [shape: bf16[8,2,128], index: 1, kind: input, shape index: {}]   ;;  %s2598_s2 = inlined_call_operand.hbm [shape: bf16[2,32,128], index: 2, kind: input, shape index: {}]   ;;  %s2599_s3 = inlined_call_operand.hbm [shape: f32[8,2,32], index: 3, kind: output, shape index: {0}]   ;;  %s2600_s4 = inlined_call_operand.hbm [shape: f32[8,2,32], index: 4, kind: output, shape index: {1}]  }
   0x1   :  { %2610 = sst [smem:[#allocation22_spill]] %s2596_s0 }
   0x2   :  { %2611 = sst [smem:[#allocation23_spill]] %s2598_s2 }
   0x3   :  { %10 = vsyncpa [#allocation7], 0 }
   0x4   :  { %12 = vsyncpa [#allocation7 + $0x1], 0 }
   0x5   :  { %13 = vsyncpa [#allocation10], 0 }
   0x6   :  { %15 = vsyncpa [#allocation10 + $0x1], 0 }
   0x7   :  { %16 = vsyncpa [#allocation8], 0 }
   0x8   :  { %18 = vsyncpa [#allocation8 + $0x1], 0 }
   0x9   :  { %19 = vsyncpa [#allocation14], 0 }
   0xa   :  { %21 = vsyncpa [#allocation14 + $0x1], 0  ;;  %s2064_s15 = smov 0   ;;  %s2066_s16 = smov 0  }
   0xb   :  { %s2068_s17 = smov 0   ;;  %s2070_s18 = smov 0  }
   0xc   :  { %s2072_s19 = smov 0   ;;  %s2074_s20 = smov 0  }
   0xd   :  { %s2076_s21 = smov 0  }
   0xe LB: > { %s2100_s22 = sadd.s32 4294967295, %s2020_s21   ;;  %s1474_s23 = sadd.s32 4294967294, %s2020_s21   ;;  %s2020_s21 = sphi %s2076_s21, %s2648_s21   ;;  %s2016_s20 = sphi %s2074_s20, %s2655_s20   ;;  %s2012_s19 = sphi %s2072_s19, %s2654_s19   ;;  %s2008_s18 = sphi %s2070_s18, %s2653_s18   ;;  %s2004_s17 = sphi %s2068_s17, %s2652_s17   ;;  %s2000_s16 = sphi %s2066_s16, %s2651_s16   ;;  %s1996_s15 = sphi %s2064_s15, %s2650_s15  }
   0xf   : > { %p47_p0 = scmp.ne.s32.totalorder %s2012_s19, %s2008_s18  ;;  %p2601_p1 = scmp.eq.s32.totalorder %s2100_s22, 0 }
  0x10   : > { %p75_p2 = scmp.ne.s32.totalorder %s2000_s16, %s1996_s15  ;;  %p126_p5 = scmp.eq.s32.totalorder %s1474_s23, 1 }
  0x11   : > { %p2111_p4 = por %p2601_p1, %p47_p0  ;;  %p1475_p7 = scmp.ge.s32.totalorder %s2020_s21, 1 }
  0x12   : > { %p2117_p6 = por %p75_p2, %p2601_p1  ;;  %p2122_p8 = por %p126_p5, %p47_p0 }
  0x13   : > { %s2612_s24 = scalar_select %p2111_p4, 1, 0 }
  0x14   : > { %s2613_s25 = scalar_select %p2117_p6, 1, 0 }
  0x15   : > { %s2614_s26 = scalar_select %p2122_p8, 1, 0 }
  0x16   : > { %p2126_p9 = por %p126_p5, %p75_p2  ;;  %p161_p10 = scmp.lt.s32.totalorder %s2020_s21, 3 }
  0x17   : > { %s2022_s29 = smov [#allocation11]   ;;  %s34_s6 = sadd.s32 1, %s2016_s20 }
  0x18   : > { %s2615_s27 = scalar_select %p2126_p9, 1, 0 }
  0x19   : > { %p2132_p12 = pnand %p1475_p7, %p161_p10  ;;  %s173_s30 = sshll.u32 %s2022_s29, 4  ;;  %s2136_s30 = int_to_ptr.vmem [resolvable:$true] %s173_s30 }
  0x1a   : > { %s2618_s2 = sld [smem:[#allocation23_spill]] }
  0x1b   : > { %s2616_s28 = scalar_select %p2132_p12, 1, 0 }
  0x1c   : > { %p1647_p13 = pneg %p2132_p12 }
  0x1e   : > { %p2144_p2 = pnand %p1647_p13, %p2601_p1 }
  0x20   : > { %s1802_s9 = scalar_lea.hbm %s2618_s2, 512  ;;  %p1804_p0 = pneg %p2144_p2 }
  0x21   : > { %p1803_p10 = scmp.ne.s32.totalorder %s2618_s2, %s1802_s9  ;;  %p1809_p13 = scmp.lt.u32.totalorder %s1802_s9, %s2618_s2 }
  0x23   : > { %p1805_p11 = pnand %p1804_p0, %p1803_p10 }
  0x25   : > { %p1806_p3 = pneg %p1805_p11 }
  0x27   : > { %p1811_p1 = pnand %p1809_p13, %p1806_p3 }
  0x29   : > { %1814 = shalt.err (!%p1811_p1)
}
  0x2a   : > { %s1815_s14 = scalar_lea.vmem %s2136_s30, 512  ;;  %p1823_p8 = scmp.lt.s32.totalorder %s2136_s30, %s2136_s30 }
  0x2b   : > { %p1816_p7 = scmp.ne.s32.totalorder %s2136_s30, %s1815_s14  ;;  %p1824_p6 = scmp.lt.s32.totalorder %s1815_s14, %s1815_s14 }
  0x2d   : > { %p1818_p5 = pnand %p1816_p7, %p1804_p0  ;;  %p1825_p4 = por %p1824_p6, %p1823_p8 }
  0x2f   : > { %p1819_p9 = pneg %p1818_p5 }
  0x31   : > { %p1826_p12 = pnand %p1825_p4, %p1819_p9 }
  0x33   : > { %1829 = shalt.err (!%p1826_p12)
}
  0x34   : > { %s2023_s23 = smov 64   ;;  %s2024_s29 = smov 4  }
  0x35   : > { %1650 = dma.hbm_to_vmem [thread:$0]  (!%p2144_p2), %s2618_s2, 512, %s2136_s30, [#allocation10], %s2023_s23, %s2023_s23, %s2024_s29  }
  0x36   : > { %p2619_p1 = scmp.ne.s32.totalorder %s2016_s20, %s2012_s19  ;;  %p2620_p3 = scmp.eq.s32.totalorder %s2020_s21, 0 }
  0x37   : > { %p2622_p8 = scmp.eq.s32.totalorder %s2100_s22, 1  ;;  %s187_s10 = sand.u32 1, %s2016_s20  }
  0x38   : > { %p43_p4 = por %p2620_p3, %p2619_p1  ;;  %p2621_p6 = pmov %p2619_p1 }
  0x39   : > { %s1543_s11 = sshll.u32 %s2020_s21, 6  ;;  %s1478_s12 = sshll.u32 %s187_s10, 2 }
  0x3a   : > { %p2183_p9 = por %p2622_p8, %p2621_p6  ;;  %s2624_s0 = sld [smem:[#allocation22_spill]] }
  0x3b   : > { %s191_s30 = scalar_lea.vmem [#allocation6], %s1478_s12  ;;  %p2625_p11 = scmp.lt.s32.totalorder %s2020_s21, 2 }
  0x3c   : > { %s198_s23 = sshll.u32 %s191_s30, 4  ;;  %s2202_s7 = scalar_lea.sflag [#allocation7], %s187_s10  ;;  %s2200_s23 = int_to_ptr.vmem [resolvable:$true] %s198_s23 }
  0x3d   : > { %p2196_p12 = pnand %p2625_p11, %p43_p4 }
  0x3f   : > { %p1832_p2 = pneg %p2196_p12 }
  0x40   : > { %s2192_s5 = scalar_lea.hbm %s2624_s0, %s1543_s11  ;;  %s1835_s13 = scalar_lea.hbm %s2624_s0, 128 }
  0x41   : > { %s1830_s8 = scalar_lea.hbm %s2192_s5, 64  ;;  %p1836_p10 = scmp.lt.u32.totalorder %s2192_s5, %s2624_s0 }
  0x42   : > { %p1831_p0 = scmp.ne.s32.totalorder %s2192_s5, %s1830_s8  ;;  %p1837_p13 = scmp.lt.u32.totalorder %s1835_s13, %s1830_s8 }
  0x43   : > { %p1839_p3 = scmp.lt.u32.totalorder %s1830_s8, %s2192_s5 }
  0x44   : > { %p1833_p5 = pnand %p1832_p2, %p1831_p0  ;;  %p1838_p1 = por %p1837_p13, %p1836_p10 }
  0x46   : > { %p1834_p7 = pneg %p1833_p5  ;;  %p1840_p4 = por %p1839_p3, %p1838_p1 }
  0x48   : > { %p1841_p6 = pnand %p1840_p4, %p1834_p7 }
  0x4a   : > { %1844 = shalt.err (!%p1841_p6)
}
  0x4b   : > { %s1845_s10 = scalar_lea.vmem %s2200_s23, 64  ;;  %s2025_s11 = smov [#allocation6]  }
  0x4c   : > { %p1846_p8 = scmp.ne.s32.totalorder %s2200_s23, %s1845_s10  ;;  %s1850_s12 = sshll.u32 %s2025_s11, 4  ;;  %s1851_s12 = int_to_ptr.vmem [resolvable:$false] %s1850_s12 }
  0x4d   : > { %s1852_s14 = scalar_lea.vmem %s1851_s12, 128  ;;  %p1853_p5 = scmp.lt.s32.totalorder %s2200_s23, %s1851_s12 }
  0x4e   : > { %p1848_p11 = pnand %p1846_p8, %p1832_p2  ;;  %p1854_p10 = scmp.lt.s32.totalorder %s1852_s14, %s1845_s10 }
  0x50   : > { %p1849_p0 = pneg %p1848_p11  ;;  %p1855_p13 = por %p1854_p10, %p1853_p5 }
  0x52   : > { %p1856_p1 = pnand %p1855_p13, %p1849_p0 }
  0x54   : > { %1859 = shalt.err (!%p1856_p1)
}
  0x55   : > { %s2605_s8 = smov 16   ;;  %s2606_s13 = smov 1  }
  0x56   : > { %1654 = dma.hbm_to_vmem [thread:$0]  (!%p2196_p12), %s2192_s5, 64, %s2200_s23, %s2202_s7, %s2605_s8, %s2605_s8, %s2606_s13  }
  0x57   : > { %s2234_s30 = sadd.s32 1, %s2020_s21   ;;  %s57_s11 = ssub.s32 1, %s2020_s21 }
  0x58   : > { %2627 = sst [smem:[#allocation20_spill]] %s2234_s30  ;;  %s31_s10 = ssub.s32 %s2020_s21, %s2234_s30 }
  0x59   : > { %p32_p2 = scmp.eq.s32.totalorder %s31_s10, 0  ;;  %s58_s12 = ssub.s32 1, %s2234_s30 }
  0x5a   : > { %s62_s14 = sadd.s32 1, %s2004_s17  ;;  %s59_s2 = ssub.s32 %s57_s11, %s58_s12 }
  0x5b   : > { %s2244_s0 = scalar_select %p32_p2, %s2016_s20, %s34_s6  }
  0x5c   : > { %p69_p7 = scmp.ne.s32.totalorder %s2004_s17, %s2000_s16  ;;  %p60_p3 = scmp.eq.s32.totalorder %s59_s2, 0 }
  0x5d   : > { %2628 = sst [smem:[#allocation21_spill]] %s2244_s0  ;;  %s208_s29 = sand.u32 1, %s2020_s21  }
  0x5e   : > { %p2629_p4 = scmp.eq.s32.totalorder %s2020_s21, 0  ;;  %p2630_p12 = scmp.eq.s32.totalorder %s2100_s22, 1 }
  0x5f   : > { %s2258_s23 = scalar_select %p60_p3, %s2004_s17, %s62_s14  }
  0x60   : > { %p71_p6 = por %p69_p7, %p2629_p4  ;;  %p2253_p8 = por %p2630_p12, %p69_p7 }
  0x61   : > { %s210_s7 = sand.u32 1, %s2004_s17   ;;  %s1544_s8 = sshll.u32 %s57_s11, 6 }
  0x62   : > { %s2631_s5 = scalar_select %p2253_p8, 1, 0 }
  0x63   : > { %s1481_s10 = sshll.u32 %s210_s7, 2  ;;  %s2264_s6 = scalar_lea.hbm %s2597_s1, %s1544_s8 }
  0x64   : > { %s212_s2 = scalar_lea.vmem [#allocation9], %s1481_s10  ;;  %p2632_p11 = scmp.lt.s32.totalorder %s2020_s21, 2 }
  0x65   : > { %s220_s12 = sshll.u32 %s212_s2, 4  ;;  %s2274_s11 = scalar_lea.sflag [#allocation10], %s208_s29  ;;  %s2272_s12 = int_to_ptr.vmem [resolvable:$true] %s220_s12 }
  0x66   : > { %p2268_p0 = pnand %p2632_p11, %p71_p6  ;;  %s1860_s13 = scalar_lea.hbm %s2264_s6, 64 }
  0x67   : > { %p1861_p5 = scmp.ne.s32.totalorder %s2264_s6, %s1860_s13  ;;  %s1865_s14 = scalar_lea.hbm %s2597_s1, 128 }
  0x68   : > { %p1862_p10 = pneg %p2268_p0  ;;  %p1866_p2 = scmp.lt.u32.totalorder %s2264_s6, %s2597_s1 }
  0x69   : > { %p1867_p7 = scmp.lt.u32.totalorder %s1865_s14, %s1860_s13  ;;  %p1869_p4 = scmp.lt.u32.totalorder %s1860_s13, %s2264_s6 }
  0x6a   : > { %p1863_p13 = pnand %p1862_p10, %p1861_p5 }
  0x6b   : > { %p1868_p3 = por %p1867_p7, %p1866_p2 }
  0x6c   : > { %p1864_p1 = pneg %p1863_p13 }
  0x6d   : > { %p1870_p6 = por %p1869_p4, %p1868_p3 }
  0x6f   : > { %p1871_p12 = pnand %p1870_p6, %p1864_p1 }
  0x71   : > { %1874 = shalt.err (!%p1871_p12)
}
  0x72   : > { %s1875_s29 = scalar_lea.vmem %s2272_s12, 64  ;;  %s2028_s2 = smov [#allocation9]  }
  0x73   : > { %p1876_p11 = scmp.ne.s32.totalorder %s2272_s12, %s1875_s29  ;;  %s1880_s8 = sshll.u32 %s2028_s2, 4  ;;  %s1881_s8 = int_to_ptr.vmem [resolvable:$false] %s1880_s8 }
  0x74   : > { %s1882_s30 = scalar_lea.vmem %s1881_s8, 128  ;;  %p1883_p8 = scmp.lt.s32.totalorder %s2272_s12, %s1881_s8 }
  0x75   : > { %p1878_p5 = pnand %p1876_p11, %p1862_p10  ;;  %p1884_p2 = scmp.lt.s32.totalorder %s1882_s30, %s1875_s29 }
  0x77   : > { %p1879_p13 = pneg %p1878_p5  ;;  %p1885_p7 = por %p1884_p2, %p1883_p8 }
  0x79   : > { %p1886_p3 = pnand %p1885_p7, %p1879_p13 }
  0x7b   : > { %1889 = shalt.err (!%p1886_p3)
}
  0x7c   : > { %s2634_s13 = smov 1   ;;  %s2635_s14 = smov 16  }
  0x7d   : > { %1657 = dma.hbm_to_vmem [thread:$0]  (!%p2268_p0), %s2264_s6, 64, %s2272_s12, %s2274_s11, %s2635_s14, %s2635_s14, %s2634_s13  }
  0x7e   : > { %p2636_p10 = scmp.ne.s32.totalorder %s2616_s28, 0 }
  0x7f   : > { %s2308_s7 = sand.u32 (!%p2636_p10), 1, %s2012_s19   ;;  %p2637_p8 = scmp.ne.s32.totalorder (!%p2636_p10), %s2612_s24, 0 }
  0x80   : > { %232 = sbr.rel (%p2636_p10) target bundleno = 3050 (0xbea), region = 32  ;;  %s1485_s10 = sshll.u32 (!%p2636_p10), %s2308_s7, 2 }
  0x81   : > { %s235_s29 = scalar_lea.sflag (!%p2636_p10), [#allocation7], %s2308_s7  ;;  %s2312_s2 = scalar_lea.vmem (!%p2636_p10), [#allocation6], %s1485_s10 }
  0x87   : > { %1975 = dma.done.wait (%p2637_p8), %s235_s29, 64  }
  0x88   : > { %1977 = vsyncadd (%p2637_p8), %s235_s29, 4294967232  ;;  %s243_s0 = sand.u32 1, %s2100_s22   ;;  %s2320_s28 = sand.u32 1, %s2000_s16  }
  0x89   : > { %s1486_s6 = sshll.u32 %s2320_s28, 2  ;;  %s244_s12 = scalar_lea.sflag [#allocation10], %s243_s0 }
  0x8a   : > { %s2323_s11 = scalar_lea.vmem [#allocation9], %s1486_s6  ;;  %p2638_p0 = scmp.ne.s32.totalorder %s2613_s25, 0 }
  0x8c   : > { %1979 = dma.done.wait (%p2638_p0), %s244_s12, 64  }
  0x8d   : > { %1981 = vsyncadd (%p2638_p0), %s244_s12, 4294967232  ;;  %p2639_p1 = scmp.eq.s32.totalorder %s2100_s22, 0 }
  0x8f   : > { %1983 = dma.done.wait (%p2639_p1), [#allocation10], 512   ;;  %p2640_p4 = pmov %p2639_p1 }
  0x90   : > { %s1488_s24 = sshll.u32 %s2308_s7, 3  ;;  %s1489_s8 = sshll.u32 %s2320_s28, 3 }
  0x91   : > { %1985 = vsyncadd (%p2640_p4), [#allocation10], 4294966784  ;;  %s2335_s30 = scalar_lea.vmem [#allocation12], %s1488_s24  ;;  %s2337_s13 = scalar_lea.vmem [#allocation13], %s1489_s8 }
  0x92   : > { %p2641_p6 = scmp.ne.s32.totalorder %s2100_s22, 0 }
  0x93   : > { %vm297_vm0 = vcmask (!%p2641_p6), 254976   ;;  %v2029_v0 = vmov (!%p2641_p6), 0.0  }
  0x94   : > { %296 = sbr.rel (%p2641_p6) target bundleno = 155 (0x9b), region = 48  ;;  %298 = vst.msk [vmem:[#allocation2] sm:$0x3] (!%p2641_p6), %vm297_vm0, %v2029_v0  ;;  %299 = vst.msk [vmem:[#allocation3] sm:$0x3] (!%p2641_p6), %vm297_vm0, %v2029_v0 }
  0x95   : > { %300 = vst.msk [vmem:[#allocation4] sm:$0x3] (!%p2641_p6), %vm297_vm0, %v2029_v0  ;;  %301 = vst.msk [vmem:[#allocation5] sm:$0x3] (!%p2641_p6), %vm297_vm0, %v2029_v0 }
  0x9b PF: > { %v1738_v1 = vld [vmem:[#allocation11] sm:$0xff]   ;;  %v2030_v2 = vmov 0.0   ;;  %v1739_v3 = vld [vmem:[#allocation11 + $0x10] sm:$0xff]   ;;  %v1740_v4 = vld [vmem:[#allocation11 + $0x8] sm:$0xff]   ;;  %vm2031_vm1 = vmmov 0   ;;  %vm322_vm2 = vcmask 261120   ;;  %v405_v53 = vlaneseq }
  0x9c   : > { %1571 = vmatprep.subr.bf16.mxu0 %v2030_v2  ;;  %1579 = vmatprep.subr.bf16.mxu1 %v2030_v2  ;;  %v1741_v5 = vld [vmem:[#allocation11 + $0x18] sm:$0xff]   ;;  %v304_v6 = vld [vmem:[#allocation2] sm:$0x3]  ;;  %v430_v7 = vld [vmem:[#allocation4] sm:$0x3]  ;;  %s2032_s25 = smov 32  }
  0x9d   : > { %1572 = vmatpush3.bf16.msra.mxu0 %v1738_v1  ;;  %1575 = vmatprep.mubr.msk.bf16.mxu0 %vm2031_vm1, %v2030_v2  ;;  %v305_v8 = vpack.c.bf16 %v304_v6, %v304_v6  ;;  %v1494_v9 = vld.sshfl [vmem:[#allocation3] sm:$0x3 pattern:$0x76325410]  ;;  %v431_v10 = vpack.c.bf16 %v430_v7, %v430_v7  ;;  %v302_v12 = vld [vmem:[%s2312_s2] sm:$0x1] }
  0x9e   : > { %1580 = vmatpush3.bf16.msra.mxu1 %v1739_v3  ;;  %1573 = vmatprep.subr.bf16.mxu0 %v2030_v2  ;;  %v1499_v11 = vld.sshfl [vmem:[#allocation5] sm:$0x3 pattern:$0x76325410]  ;;  %v1495_v13 = vld [vmem:[%s2323_s11 + $0x3] sm:$0x1]  ;;  %v303_v14 = vunpack.c.l.bf16 %v302_v12 }
  0x9f   : > { %1581 = vmatprep.subr.bf16.mxu1 %v2030_v2  ;;  %1583 = vmatprep.mubr.msk.bf16.mxu1 %vm2031_vm1, %v2030_v2  ;;  %v429_v15 = vunpack.c.l.bf16 %v1495_v13  ;;  %s2033_s14 = smov 64   ;;  %v1742_v50 = vld [vmem:[#allocation11] sm:$0xff]   ;;  %v2034_v51 = vmov 1983009808   ;;  %v1743_v54 = vld [vmem:[#allocation11 + $0x10] sm:$0xff]   ;;  %v1744_v55 = vld [vmem:[#allocation11 + $0x8] sm:$0xff]  }
  0xa0   : > { %381 = vrot.lane.b32.xlu1 %v1494_v9, %s2032_s25  ;;  %v403_v52 = vunpack.c.l.s4 %v2034_v51  ;;  %v406_v57 = vshrl.u32 %v405_v53, 7  ;;  %v1745_v61 = vld [vmem:[#allocation11 + $0x18] sm:$0xff]   ;;  %s2035_s10 = smov 96   ;;  %vm412_vm3 = vcmask 254976   ;;  %v1501_v13 = vld [vmem:[%s2312_s2 + $0x1] sm:$0x1] }
  0xa1   : > { %1574 = vmatpush3.bf16.msra.mxu0 %v1740_v4  ;;  %v1746_v53 = vld [vmem:[#allocation11] sm:$0xff]   ;;  %s1545_s29 = sshll.u32 %s2100_s22, 7  ;;  %s1330_s0 = ssub.s32 1, %s2100_s22 }
  0xa2   : > { %1582 = vmatpush3.bf16.msra.mxu1 %v1741_v5  ;;  %1587 = vmatprep.subr.bf16.mxu0 %v2030_v2  ;;  %v404_v56 = vunpack.c.0.s8 %v403_v52  ;;  %s2489_s24 = sshll.u32 %s1330_s0, 7 }
  0xa3   : > { %1595 = vmatprep.subr.bf16.mxu1 %v2030_v2 }
  0xa4   : > { %1576 = vmatmul.mubr.msk.bf16.vlgmr.msra.gmra.mrb[0].mxu0 %vm322_vm2, %v305_v8  ;;  %507 = vrot.lane.b32.xlu1 %v1499_v11, %s2032_s25  ;;  %v2370_v59 = vsub.s32 %v404_v56, %v406_v57 }
  0xa5   : > { %1584 = vmatmul.mubr.msk.bf16.vlgmr.msra.gmra.mrb[0].mxu1 %vm322_vm2, %v431_v10  ;;  %1591 = vmatprep.mubr.msk.bf16.mxu0 %vm2031_vm1, %v2030_v2 }
  0xa6   : > { %1599 = vmatprep.mubr.msk.bf16.mxu1 %vm2031_vm1, %v2030_v2  ;;  %1588 = vmatpush3.bf16.msra.mxu0 %v1742_v50 }
  0xa7   : > { %1589 = vmatprep.subr.bf16.mxu0 %v2030_v2  ;;  %1596 = vmatpush3.bf16.msra.mxu1 %v1743_v54  ;;  %v1747_v54 = vld [vmem:[#allocation11 + $0x10] sm:$0xff]  }
  0xa8   : > { %1597 = vmatprep.subr.bf16.mxu1 %v2030_v2 }
  0xaa   : > { %1590 = vmatpush3.bf16.msra.mxu0 %v1744_v55  ;;  %v1748_v55 = vld [vmem:[#allocation11 + $0x8] sm:$0xff]  }
  0xab   : > { %1603 = vmatprep.subr.bf16.mxu0 %v2030_v2  ;;  %1598 = vmatpush3.bf16.msra.mxu1 %v1745_v61 }
  0xac   : > { %1611 = vmatprep.subr.bf16.mxu1 %v2030_v2 }
 0x112   : > { %v382_v40 = vpop.permute.xlu1 %381 }
 0x116   : > { %v508_v42 = vpop.permute.xlu1 %507 }
 0x177   : > { %v360_v16 = vpop.f32.mrb[0].mxu0 }
 0x178   : > { %v366_v17 = vadd.f32 %v360_v16, %v303_v14  ;;  %v1577_v18 = vpop.f32.mrb[1].mxu0  ;;  %v486_v19 = vpop.f32.mrb[0].mxu1  ;;  %v555_v14 = vunpack.c.l.bf16 %v1501_v13  ;;  %v1519_v13 = vld [vmem:[%s2323_s11 + $0x1] sm:$0x1] }
 0x179   : > { %v492_v20 = vadd.f32 %v486_v19, %v429_v15  ;;  %v363_v21 = vpop.f32.mrb[2].mxu0  ;;  %v1585_v22 = vpop.f32.mrb[1].mxu1  ;;  %v1507_v15 = vld [vmem:[%s2323_s11 + $0x2] sm:$0x1] }
 0x17a   : > { %1754 = vtanh.f32 %v366_v17  ;;  %v1578_v23 = vpop.f32.mrb[3].mxu0  ;;  %v489_v24 = vpop.f32.mrb[2].mxu1  ;;  %v368_v28 = vmul.f32 0.5, %v366_v17  ;;  %v680_v19 = vunpack.c.l.bf16 %v1507_v15 }
 0x17b   : > { %v1586_v25 = vpop.f32.mrb[3].mxu1  ;;  %1756 = vtanh.f32 %v492_v20  ;;  %v494_v29 = vmul.f32 0.5, %v492_v20 }
 0x17c   : > { %1758 = vtanh.f32 %v368_v28 }
 0x17d   : > { %1760 = vtanh.f32 %v494_v29 }
 0x184   : > { %v1755_v26 = vpop.eup %1754 }
 0x185   : > { %386 = vrot.lane.b32.xlu0 %v1755_v26, %s2033_s14  ;;  %v1757_v27 = vpop.eup %1756 }
 0x186   : > { %v1759_v30 = vpop.eup %1758 }
 0x187   : > { %v370_v31 = vadd.f32 1.0, %v1759_v30  ;;  %v1761_v32 = vpop.eup %1760 }
 0x188   : > { %v496_v34 = vadd.f32 1.0, %v1761_v32 }
 0x189   : > { %512 = vrot.lane.b32.xlu0 %v1757_v27, %s2033_s14  ;;  %v371_v33 = vmul.f32 0.5, %v370_v31 }
 0x18a   : > { %v497_v37 = vmul.f32 0.5, %v496_v34 }
 0x18b   : > { %v384_v41 = vmul.f32 %v382_v40, %v371_v33 }
 0x18c   : > { %v510_v45 = vmul.f32 %v508_v42, %v497_v37 }
 0x1f7   : > { %v387_v35 = vpop.permute.xlu0 %386 }
 0x1f8   : > { %v389_v36 = vmul.f32 %v387_v35, %v371_v33 }
 0x1fa   : > { %391 = vrot.lane.b32.xlu0 %v389_v36, %s2032_s25 }
 0x1fb   : > { %v513_v38 = vpop.permute.xlu0 %512 }
 0x1fc   : > { %v515_v39 = vmul.f32 %v513_v38, %v497_v37 }
 0x1fe   : > { %517 = vrot.lane.b32.xlu1 %v515_v39, %s2032_s25 }
 0x26c   : > { %v392_v43 = vpop.permute.xlu0 %391 }
 0x26d   : > { %v394_v44 = vadd.f32 %v392_v43, %v384_v41 }
 0x26f   : > { %1762 = vtanh.f32 %v394_v44  ;;  %v421_v1 = vrot.slane %v394_v44, %v2370_v59 }
 0x270   : > { %v518_v46 = vpop.permute.xlu1 %517 }
 0x271   : > { %v520_v47 = vadd.f32 %v518_v46, %v510_v45 }
 0x273   : > { %1764 = vtanh.f32 %v520_v47  ;;  %v546_v4 = vrot.slane %v520_v47, %v2370_v59 }
 0x279   : > { %v1763_v48 = vpop.eup %1762 }
 0x27a   : > { %397 = vrot.lane.b32.xlu0 %v1763_v48, %s2033_s14 }
 0x27d   : > { %v1765_v49 = vpop.eup %1764 }
 0x27e   : > { %523 = vrot.lane.b32.xlu1 %v1765_v49, %s2033_s14 }
 0x2ec   : > { %v398_v58 = vpop.permute.xlu0 %397 }
 0x2ed   : > { %v400_v60 = vmul.f32 %v398_v58, %v371_v33  ;;  %v1749_v58 = vld [vmem:[#allocation11 + $0x18] sm:$0xff]  }
 0x2ef   : > { %v408_v62 = vrot.slane %v400_v60, %v2370_v59 }
 0x2f0   : > { %v524_v63 = vpop.permute.xlu1 %523 }
 0x2f1   : > { %v526_v0 = vmul.f32 %v524_v63, %v497_v37  ;;  %409 = vrot.lane.b32.xlu0 %v408_v62, %s2032_s25 }
 0x2f3   : > { %v534_v3 = vrot.slane %v526_v0, %v2370_v59 }
 0x2f5   : > { %535 = vrot.lane.b32.xlu1 %v534_v3, %s2032_s25  ;;  %422 = vrot.lane.b32.xlu0 %v421_v1, %s2035_s10 }
 0x2f9   : > { %547 = vrot.lane.b32.xlu1 %v546_v4, %s2035_s10 }
 0x363   : > { %v410_v5 = vpop.permute.xlu0 %409 }
 0x364   : > { %413 = vst.msk [vmem:[#allocation2] sm:$0x3] %vm412_vm3, %v410_v5  ;;  %426 = vst.msk [vmem:[%s2335_s30] sm:$0x3] %vm412_vm3, %v410_v5 }
 0x367   : > { %v536_v6 = vpop.permute.xlu1 %535  ;;  %v423_v7 = vpop.permute.xlu0 %422 }
 0x368   : > { %538 = vst.msk [vmem:[#allocation4] sm:$0x3] %vm412_vm3, %v536_v6  ;;  %1500 = vst.msk [vmem:[%s2337_s13 + $0x6] sm:$0x3] %vm412_vm3, %v536_v6 }
 0x369   : > { %425 = vst.msk [vmem:[#allocation3] sm:$0x3] %vm412_vm3, %v423_v7 }
 0x36b   : > { %v548_v8 = vpop.permute.xlu1 %547  ;;  %v556_v9 = vld [vmem:[#allocation2] sm:$0x3] }
 0x36c   : > { %550 = vst.msk [vmem:[#allocation5] sm:$0x3] %vm412_vm3, %v548_v8  ;;  %v557_v10 = vpack.c.bf16 %v556_v9, %v556_v9 }
 0x36e   : > { %1592 = vmatmul.mubr.msk.bf16.vlgmr.msra.gmra.mrb[4].mxu0 %vm322_vm2, %v557_v10 }
 0x36f   : > { %v681_v11 = vld [vmem:[#allocation4] sm:$0x3]  ;;  %1607 = vmatprep.mubr.msk.bf16.mxu0 %vm2031_vm1, %v2030_v2  ;;  %1604 = vmatpush3.bf16.msra.mxu0 %v1746_v53 }
 0x370   : > { %v682_v12 = vpack.c.bf16 %v681_v11, %v681_v11  ;;  %v1505_v29 = vld.sshfl [vmem:[#allocation3] sm:$0x3 pattern:$0x76325410]  ;;  %1605 = vmatprep.subr.bf16.mxu0 %v2030_v2  ;;  %v1513_v11 = vld [vmem:[%s2312_s2 + $0x2] sm:$0x1] }
 0x371   : > { %v1752_v53 = vld [vmem:[#allocation11 + $0x8] sm:$0xff]  }
 0x372   : > { %1600 = vmatmul.mubr.msk.bf16.vlgmr.msra.gmra.mrb[4].mxu1 %vm322_vm2, %v682_v12  ;;  %v805_v12 = vunpack.c.l.bf16 %v1513_v11 }
 0x373   : > { %1615 = vmatprep.mubr.msk.bf16.mxu1 %vm2031_vm1, %v2030_v2  ;;  %v1511_v30 = vld.sshfl [vmem:[#allocation5] sm:$0x3 pattern:$0x76325410]  ;;  %1612 = vmatpush3.bf16.msra.mxu1 %v1747_v54 }
 0x374   : > { %1606 = vmatpush3.bf16.msra.mxu0 %v1748_v55  ;;  %1613 = vmatprep.subr.bf16.mxu1 %v2030_v2 }
 0x375   : > { %1619 = vmatprep.subr.bf16.mxu0 %v2030_v2 }
 0x377   : > { %1614 = vmatpush3.bf16.msra.mxu1 %v1749_v58 }
 0x378   : > { %1627 = vmatprep.subr.bf16.mxu1 %v2030_v2 }
 0x441   : > { %v611_v16 = vpop.f32.mrb[4].mxu0 }
 0x442   : > { %v617_v17 = vadd.f32 %v611_v16, %v555_v14  ;;  %v1593_v18 = vpop.f32.mrb[5].mxu0 }
 0x443   : > { %v614_v20 = vpop.f32.mrb[6].mxu0 }
 0x444   : > { %1766 = vtanh.f32 %v617_v17  ;;  %v1594_v21 = vpop.f32.mrb[7].mxu0  ;;  %v619_v31 = vmul.f32 0.5, %v617_v17  ;;  %v930_v17 = vunpack.c.l.bf16 %v1519_v13 }
 0x445   : > { %v736_v22 = vpop.f32.mrb[4].mxu1 }
 0x446   : > { %v742_v23 = vadd.f32 %v736_v22, %v680_v19  ;;  %v1601_v24 = vpop.f32.mrb[5].mxu1 }
 0x447   : > { %v739_v25 = vpop.f32.mrb[6].mxu1 }
 0x448   : > { %1768 = vtanh.f32 %v742_v23  ;;  %v1602_v26 = vpop.f32.mrb[7].mxu1  ;;  %v744_v32 = vmul.f32 0.5, %v742_v23 }
 0x449   : > { %1770 = vtanh.f32 %v619_v31 }
 0x44a   : > { %1772 = vtanh.f32 %v744_v32 }
 0x44e   : > { %v1767_v27 = vpop.eup %1766 }
 0x44f   : > { %637 = vrot.lane.b32.xlu0 %v1767_v27, %s2033_s14 }
 0x452   : > { %v1769_v28 = vpop.eup %1768 }
 0x453   : > { %762 = vrot.lane.b32.xlu1 %v1769_v28, %s2033_s14  ;;  %632 = vrot.lane.b32.xlu0 %v1505_v29, %s2032_s25  ;;  %v1771_v33 = vpop.eup %1770 }
 0x454   : > { %v621_v34 = vadd.f32 1.0, %v1771_v33  ;;  %v1773_v35 = vpop.eup %1772 }
 0x455   : > { %v746_v37 = vadd.f32 1.0, %v1773_v35 }
 0x456   : > { %v622_v36 = vmul.f32 0.5, %v621_v34 }
 0x457   : > { %757 = vrot.lane.b32.xlu1 %v1511_v30, %s2032_s25  ;;  %v747_v40 = vmul.f32 0.5, %v746_v37 }
 0x4c1   : > { %v638_v38 = vpop.permute.xlu0 %637 }
 0x4c2   : > { %v640_v39 = vmul.f32 %v638_v38, %v622_v36 }
 0x4c4   : > { %642 = vrot.lane.b32.xlu0 %v640_v39, %s2032_s25 }
 0x4c5   : > { %v763_v41 = vpop.permute.xlu1 %762  ;;  %v633_v43 = vpop.permute.xlu0 %632 }
 0x4c6   : > { %v765_v42 = vmul.f32 %v763_v41, %v747_v40  ;;  %v635_v44 = vmul.f32 %v633_v43, %v622_v36 }
 0x4c8   : > { %767 = vrot.lane.b32.xlu1 %v765_v42, %s2032_s25 }
 0x4c9   : > { %v758_v45 = vpop.permute.xlu1 %757 }
 0x4ca   : > { %v760_v48 = vmul.f32 %v758_v45, %v747_v40 }
 0x536   : > { %v643_v46 = vpop.permute.xlu0 %642 }
 0x537   : > { %v645_v47 = vadd.f32 %v643_v46, %v635_v44 }
 0x539   : > { %1774 = vtanh.f32 %v645_v47  ;;  %v671_v63 = vrot.slane %v645_v47, %v2370_v59 }
 0x53a   : > { %v768_v49 = vpop.permute.xlu1 %767 }
 0x53b   : > { %v770_v50 = vadd.f32 %v768_v49, %v760_v48 }
 0x53d   : > { %1776 = vtanh.f32 %v770_v50  ;;  %v796_v1 = vrot.slane %v770_v50, %v2370_v59 }
 0x543   : > { %v1775_v51 = vpop.eup %1774 }
 0x544   : > { %648 = vrot.lane.b32.xlu0 %v1775_v51, %s2033_s14  ;;  %v1750_v51 = vld [vmem:[#allocation11] sm:$0xff]  }
 0x547   : > { %v1777_v52 = vpop.eup %1776 }
 0x548   : > { %773 = vrot.lane.b32.xlu1 %v1777_v52, %s2033_s14  ;;  %v1751_v52 = vld [vmem:[#allocation11 + $0x10] sm:$0xff]  }
 0x5b6   : > { %v649_v56 = vpop.permute.xlu0 %648 }
 0x5b7   : > { %v651_v57 = vmul.f32 %v649_v56, %v622_v36  ;;  %v1753_v56 = vld [vmem:[#allocation11 + $0x18] sm:$0xff]  }
 0x5b9   : > { %v659_v60 = vrot.slane %v651_v57, %v2370_v59 }
 0x5ba   : > { %v774_v61 = vpop.permute.xlu1 %773 }
 0x5bb   : > { %v776_v62 = vmul.f32 %v774_v61, %v747_v40  ;;  %660 = vrot.lane.b32.xlu0 %v659_v60, %s2032_s25 }
 0x5bd   : > { %v784_v0 = vrot.slane %v776_v62, %v2370_v59 }
 0x5bf   : > { %785 = vrot.lane.b32.xlu1 %v784_v0, %s2032_s25  ;;  %672 = vrot.lane.b32.xlu0 %v671_v63, %s2035_s10 }
 0x5c3   : > { %797 = vrot.lane.b32.xlu1 %v796_v1, %s2035_s10 }
 0x62d   : > { %v661_v3 = vpop.permute.xlu0 %660 }
 0x62e   : > { %663 = vst.msk [vmem:[#allocation2] sm:$0x3] %vm412_vm3, %v661_v3  ;;  %1506 = vst.msk [vmem:[%s2335_s30 + $0x2] sm:$0x3] %vm412_vm3, %v661_v3 }
 0x631   : > { %v786_v4 = vpop.permute.xlu1 %785  ;;  %v673_v5 = vpop.permute.xlu0 %672 }
 0x632   : > { %788 = vst.msk [vmem:[#allocation4] sm:$0x3] %vm412_vm3, %v786_v4  ;;  %1512 = vst.msk [vmem:[%s2337_s13 + $0x4] sm:$0x3] %vm412_vm3, %v786_v4 }
 0x633   : > { %675 = vst.msk [vmem:[#allocation3] sm:$0x3] %vm412_vm3, %v673_v5 }
 0x635   : > { %v798_v6 = vpop.permute.xlu1 %797  ;;  %v806_v7 = vld [vmem:[#allocation2] sm:$0x3] }
 0x636   : > { %800 = vst.msk [vmem:[#allocation5] sm:$0x3] %vm412_vm3, %v798_v6  ;;  %v807_v8 = vpack.c.bf16 %v806_v7, %v806_v7 }
 0x638   : > { %1608 = vmatmul.mubr.msk.bf16.vlgmr.msra.gmra.mrb[8].mxu0 %vm322_vm2, %v807_v8  ;;  %v1525_v8 = vld [vmem:[%s2312_s2 + $0x3] sm:$0x1]  ;;  %s1320_s2 = sshll.u32 %s2335_s30, 4  ;;  %s2487_s2 = int_to_ptr.vmem [resolvable:$true] %s1320_s2 }
 0x639   : > { %v931_v9 = vld [vmem:[#allocation4] sm:$0x3]  ;;  %1623 = vmatprep.mubr.msk.bf16.mxu0 %vm2031_vm1, %v2030_v2  ;;  %1620 = vmatpush3.bf16.msra.mxu0 %v1750_v51  ;;  %s1890_s22 = scalar_lea.vmem %s2487_s2, 128 }
 0x63a   : > { %v932_v10 = vpack.c.bf16 %v931_v9, %v931_v9  ;;  %v1517_v27 = vld.sshfl [vmem:[#allocation3] sm:$0x3 pattern:$0x76325410]  ;;  %1621 = vmatprep.subr.bf16.mxu0 %v2030_v2  ;;  %v1055_v9 = vunpack.c.l.bf16 %v1525_v8  ;;  %p1891_p12 = scmp.ne.s32.totalorder %s2487_s2, %s1890_s22 }
 0x63c   : > { %1616 = vmatmul.mubr.msk.bf16.vlgmr.msra.gmra.mrb[8].mxu1 %vm322_vm2, %v932_v10  ;;  %v1178_v10 = vld [vmem:[%s2323_s11] sm:$0x1]  ;;  %s2485_s11 = scalar_lea.hbm %s2599_s3, %s1545_s29  ;;  %p1892_p11 = pnand %p1891_p12, %p2183_p9 }
 0x63d   : > { %1631 = vmatprep.mubr.msk.bf16.mxu1 %vm2031_vm1, %v2030_v2  ;;  %v1523_v28 = vld.sshfl [vmem:[#allocation5] sm:$0x3 pattern:$0x76325410]  ;;  %1628 = vmatpush3.bf16.msra.mxu1 %v1751_v52 }
 0x63e   : > { %1622 = vmatpush3.bf16.msra.mxu0 %v1752_v53  ;;  %1629 = vmatprep.subr.bf16.mxu1 %v2030_v2  ;;  %p1893_p5 = pneg %p1892_p11 }
 0x641   : > { %1630 = vmatpush3.bf16.msra.mxu1 %v1753_v56 }
 0x70b   : > { %v861_v14 = vpop.f32.mrb[8].mxu0 }
 0x70c   : > { %v867_v15 = vadd.f32 %v861_v14, %v805_v12  ;;  %v1609_v16 = vpop.f32.mrb[9].mxu0  ;;  %v1179_v14 = vunpack.c.l.bf16 %v1178_v10 }
 0x70d   : > { %v864_v18 = vpop.f32.mrb[10].mxu0 }
 0x70e   : > { %1778 = vtanh.f32 %v867_v15  ;;  %v1610_v19 = vpop.f32.mrb[11].mxu0  ;;  %v869_v29 = vmul.f32 0.5, %v867_v15 }
 0x70f   : > { %v986_v20 = vpop.f32.mrb[8].mxu1 }
 0x710   : > { %v992_v21 = vadd.f32 %v986_v20, %v930_v17  ;;  %v1617_v22 = vpop.f32.mrb[9].mxu1 }
 0x711   : > { %v989_v23 = vpop.f32.mrb[10].mxu1 }
 0x712   : > { %1780 = vtanh.f32 %v992_v21  ;;  %v1618_v24 = vpop.f32.mrb[11].mxu1  ;;  %v994_v30 = vmul.f32 0.5, %v992_v21 }
 0x713   : > { %1782 = vtanh.f32 %v869_v29 }
 0x714   : > { %1784 = vtanh.f32 %v994_v30 }
 0x718   : > { %v1779_v25 = vpop.eup %1778 }
 0x719   : > { %887 = vrot.lane.b32.xlu0 %v1779_v25, %s2033_s14 }
 0x71c   : > { %v1781_v26 = vpop.eup %1780 }
 0x71d   : > { %1012 = vrot.lane.b32.xlu1 %v1781_v26, %s2033_s14  ;;  %882 = vrot.lane.b32.xlu0 %v1517_v27, %s2032_s25  ;;  %v1783_v31 = vpop.eup %1782 }
 0x71e   : > { %v871_v32 = vadd.f32 1.0, %v1783_v31  ;;  %v1785_v33 = vpop.eup %1784 }
 0x71f   : > { %v996_v35 = vadd.f32 1.0, %v1785_v33 }
 0x720   : > { %v872_v34 = vmul.f32 0.5, %v871_v32 }
 0x721   : > { %1007 = vrot.lane.b32.xlu1 %v1523_v28, %s2032_s25  ;;  %v997_v38 = vmul.f32 0.5, %v996_v35 }
 0x78b   : > { %v888_v36 = vpop.permute.xlu0 %887 }
 0x78c   : > { %v890_v37 = vmul.f32 %v888_v36, %v872_v34 }
 0x78e   : > { %892 = vrot.lane.b32.xlu0 %v890_v37, %s2032_s25 }
 0x78f   : > { %v1013_v39 = vpop.permute.xlu1 %1012  ;;  %v883_v41 = vpop.permute.xlu0 %882 }
 0x790   : > { %v1015_v40 = vmul.f32 %v1013_v39, %v997_v38  ;;  %v885_v42 = vmul.f32 %v883_v41, %v872_v34 }
 0x792   : > { %1017 = vrot.lane.b32.xlu1 %v1015_v40, %s2032_s25 }
 0x793   : > { %v1008_v43 = vpop.permute.xlu1 %1007 }
 0x794   : > { %v1010_v46 = vmul.f32 %v1008_v43, %v997_v38 }
 0x800   : > { %v893_v44 = vpop.permute.xlu0 %892 }
 0x801   : > { %v895_v45 = vadd.f32 %v893_v44, %v885_v42 }
 0x803   : > { %1786 = vtanh.f32 %v895_v45  ;;  %v921_v61 = vrot.slane %v895_v45, %v2370_v59 }
 0x804   : > { %v1018_v47 = vpop.permute.xlu1 %1017 }
 0x805   : > { %v1020_v48 = vadd.f32 %v1018_v47, %v1010_v46 }
 0x807   : > { %1788 = vtanh.f32 %v1020_v48  ;;  %v1046_v2 = vrot.slane %v1020_v48, %v2370_v59 }
 0x80d   : > { %v1787_v49 = vpop.eup %1786 }
 0x80e   : > { %898 = vrot.lane.b32.xlu0 %v1787_v49, %s2033_s14 }
 0x811   : > { %v1789_v50 = vpop.eup %1788 }
 0x812   : > { %1023 = vrot.lane.b32.xlu1 %v1789_v50, %s2033_s14 }
 0x880   : > { %v899_v54 = vpop.permute.xlu0 %898 }
 0x881   : > { %v901_v55 = vmul.f32 %v899_v54, %v872_v34 }
 0x883   : > { %v909_v57 = vrot.slane %v901_v55, %v2370_v59 }
 0x884   : > { %v1024_v58 = vpop.permute.xlu1 %1023 }
 0x885   : > { %v1026_v60 = vmul.f32 %v1024_v58, %v997_v38  ;;  %910 = vrot.lane.b32.xlu0 %v909_v57, %s2032_s25 }
 0x887   : > { %v1034_v62 = vrot.slane %v1026_v60, %v2370_v59 }
 0x889   : > { %1035 = vrot.lane.b32.xlu1 %v1034_v62, %s2032_s25  ;;  %922 = vrot.lane.b32.xlu0 %v921_v61, %s2035_s10 }
 0x88d   : > { %1047 = vrot.lane.b32.xlu1 %v1046_v2, %s2035_s10 }
 0x8f7   : > { %v911_v63 = vpop.permute.xlu0 %910 }
 0x8f8   : > { %913 = vst.msk [vmem:[#allocation2] sm:$0x3] %vm412_vm3, %v911_v63  ;;  %1518 = vst.msk [vmem:[%s2335_s30 + $0x4] sm:$0x3] %vm412_vm3, %v911_v63 }
 0x8fb   : > { %v1036_v0 = vpop.permute.xlu1 %1035  ;;  %v923_v1 = vpop.permute.xlu0 %922 }
 0x8fc   : > { %1038 = vst.msk [vmem:[#allocation4] sm:$0x3] %vm412_vm3, %v1036_v0  ;;  %1524 = vst.msk [vmem:[%s2337_s13 + $0x2] sm:$0x3] %vm412_vm3, %v1036_v0 }
 0x8fd   : > { %925 = vst.msk [vmem:[#allocation3] sm:$0x3] %vm412_vm3, %v923_v1 }
 0x8ff   : > { %v1048_v3 = vpop.permute.xlu1 %1047  ;;  %v1056_v4 = vld [vmem:[#allocation2] sm:$0x3] }
 0x900   : > { %1050 = vst.msk [vmem:[#allocation5] sm:$0x3] %vm412_vm3, %v1048_v3  ;;  %v1057_v5 = vpack.c.bf16 %v1056_v4, %v1056_v4 }
 0x902   : > { %1624 = vmatmul.mubr.msk.bf16.vlgmr.msra.gmra.mrb[12].mxu0 %vm322_vm2, %v1057_v5 }
 0x903   : > { %v1180_v6 = vld [vmem:[#allocation4] sm:$0x3] }
 0x904   : > { %v1181_v7 = vpack.c.bf16 %v1180_v6, %v1180_v6  ;;  %v1529_v24 = vld.sshfl [vmem:[#allocation3] sm:$0x3 pattern:$0x76325410] }
 0x906   : > { %1632 = vmatmul.mubr.msk.bf16.vlgmr.msra.gmra.mrb[12].mxu1 %vm322_vm2, %v1181_v7 }
 0x907   : > { %v1534_v25 = vld.sshfl [vmem:[#allocation5] sm:$0x3 pattern:$0x76325410] }
 0x9d5   : > { %v1111_v11 = vpop.f32.mrb[12].mxu0 }
 0x9d6   : > { %v1117_v12 = vadd.f32 %v1111_v11, %v1055_v9  ;;  %v1625_v13 = vpop.f32.mrb[13].mxu0 }
 0x9d7   : > { %v1114_v15 = vpop.f32.mrb[14].mxu0 }
 0x9d8   : > { %1790 = vtanh.f32 %v1117_v12  ;;  %v1626_v16 = vpop.f32.mrb[15].mxu0  ;;  %v1119_v26 = vmul.f32 0.5, %v1117_v12 }
 0x9d9   : > { %v1235_v17 = vpop.f32.mrb[12].mxu1 }
 0x9da   : > { %v1241_v18 = vadd.f32 %v1235_v17, %v1179_v14  ;;  %v1633_v19 = vpop.f32.mrb[13].mxu1 }
 0x9db   : > { %v1238_v20 = vpop.f32.mrb[14].mxu1 }
 0x9dc   : > { %1792 = vtanh.f32 %v1241_v18  ;;  %v1634_v21 = vpop.f32.mrb[15].mxu1  ;;  %v1243_v27 = vmul.f32 0.5, %v1241_v18 }
 0x9dd   : > { %1794 = vtanh.f32 %v1119_v26 }
 0x9de   : > { %1796 = vtanh.f32 %v1243_v27 }
 0x9e2   : > { %v1791_v22 = vpop.eup %1790 }
 0x9e3   : > { %1137 = vrot.lane.b32.xlu0 %v1791_v22, %s2033_s14 }
 0x9e6   : > { %v1793_v23 = vpop.eup %1792 }
 0x9e7   : > { %1261 = vrot.lane.b32.xlu1 %v1793_v23, %s2033_s14  ;;  %1132 = vrot.lane.b32.xlu0 %v1529_v24, %s2032_s25  ;;  %v1795_v28 = vpop.eup %1794 }
 0x9e8   : > { %v1121_v29 = vadd.f32 1.0, %v1795_v28  ;;  %v1797_v30 = vpop.eup %1796 }
 0x9e9   : > { %v1245_v32 = vadd.f32 1.0, %v1797_v30 }
 0x9ea   : > { %v1122_v31 = vmul.f32 0.5, %v1121_v29 }
 0x9eb   : > { %1256 = vrot.lane.b32.xlu1 %v1534_v25, %s2032_s25  ;;  %v1246_v35 = vmul.f32 0.5, %v1245_v32 }
 0xa55   : > { %v1138_v33 = vpop.permute.xlu0 %1137 }
 0xa56   : > { %v1140_v34 = vmul.f32 %v1138_v33, %v1122_v31 }
 0xa58   : > { %1142 = vrot.lane.b32.xlu0 %v1140_v34, %s2032_s25 }
 0xa59   : > { %v1262_v36 = vpop.permute.xlu1 %1261  ;;  %v1133_v38 = vpop.permute.xlu0 %1132 }
 0xa5a   : > { %v1264_v37 = vmul.f32 %v1262_v36, %v1246_v35  ;;  %v1135_v39 = vmul.f32 %v1133_v38, %v1122_v31 }
 0xa5c   : > { %1266 = vrot.lane.b32.xlu1 %v1264_v37, %s2032_s25 }
 0xa5d   : > { %v1257_v40 = vpop.permute.xlu1 %1256 }
 0xa5e   : > { %v1259_v43 = vmul.f32 %v1257_v40, %v1246_v35 }
 0xaca   : > { %v1143_v41 = vpop.permute.xlu0 %1142 }
 0xacb   : > { %v1145_v42 = vadd.f32 %v1143_v41, %v1135_v39 }
 0xacd   : > { %1798 = vtanh.f32 %v1145_v42  ;;  %v1171_v53 = vrot.slane %v1145_v42, %v2370_v59 }
 0xace   : > { %v1267_v44 = vpop.permute.xlu1 %1266 }
 0xacf   : > { %v1269_v45 = vadd.f32 %v1267_v44, %v1259_v43 }
 0xad1   : > { %1800 = vtanh.f32 %v1269_v45  ;;  %v1295_v55 = vrot.slane %v1269_v45, %v2370_v59 }
 0xad7   : > { %v1799_v46 = vpop.eup %1798 }
 0xad8   : > { %1148 = vrot.lane.b32.xlu0 %v1799_v46, %s2033_s14 }
 0xadb   : > { %v1801_v47 = vpop.eup %1800 }
 0xadc   : > { %1272 = vrot.lane.b32.xlu1 %v1801_v47, %s2033_s14  ;;  %s1302_s14 = scalar_lea.sflag [#allocation8], %s2308_s7 }
 0xb4a   : > { %v1149_v48 = vpop.permute.xlu0 %1148 }
 0xb4b   : > { %v1151_v49 = vmul.f32 %v1149_v48, %v1122_v31 }
 0xb4d   : > { %v1159_v50 = vrot.slane %v1151_v49, %v2370_v59 }
 0xb4e   : > { %v1273_v51 = vpop.permute.xlu1 %1272 }
 0xb4f   : > { %v1275_v52 = vmul.f32 %v1273_v51, %v1246_v35  ;;  %1160 = vrot.lane.b32.xlu0 %v1159_v50, %s2032_s25 }
 0xb51   : > { %v1283_v54 = vrot.slane %v1275_v52, %v2370_v59 }
 0xb53   : > { %1284 = vrot.lane.b32.xlu1 %v1283_v54, %s2032_s25  ;;  %1172 = vrot.lane.b32.xlu0 %v1171_v53, %s2035_s10 }
 0xb57   : > { %1296 = vrot.lane.b32.xlu1 %v1295_v55, %s2035_s10  ;;  %s2036_s10 = smov [#allocation12]  }
 0xb58   : > { %s1894_s29 = sshll.u32 %s2036_s10, 4  ;;  %s1895_s29 = int_to_ptr.vmem [resolvable:$false] %s1894_s29 }
 0xb59   : > { %s1896_s6 = scalar_lea.vmem %s1895_s29, 256  ;;  %p1897_p13 = scmp.lt.s32.totalorder %s2487_s2, %s1895_s29 }
 0xb5a   : > { %p1898_p2 = scmp.lt.s32.totalorder %s1896_s6, %s1890_s22 }
 0xb5c   : > { %p1899_p7 = por %p1898_p2, %p1897_p13 }
 0xb5e   : > { %p1900_p3 = pnand %p1899_p7, %p1893_p5 }
 0xbc1   : > { %v1161_v56 = vpop.permute.xlu0 %1160 }
 0xbc2   : > { %1163 = vst.msk [vmem:[#allocation2] sm:$0x3] %vm412_vm3, %v1161_v56  ;;  %1530 = vst.msk [vmem:[%s2335_s30 + $0x6] sm:$0x3] %vm412_vm3, %v1161_v56 }
 0xbc3   : > { %1903 = shalt.err (!%p1900_p3)
}
 0xbc4   : > { %s1904_s30 = scalar_lea.hbm %s2485_s11, 128  ;;  %s1908_s10 = scalar_lea.hbm %s2599_s3, 256 }
 0xbc5   : > { %p1905_p10 = scmp.ne.s32.totalorder %s2485_s11, %s1904_s30  ;;  %p1909_p1 = scmp.lt.u32.totalorder %s2485_s11, %s2599_s3 }
 0xbc6   : > { %p1910_p4 = scmp.lt.u32.totalorder %s1908_s10, %s1904_s30  ;;  %p1912_p12 = scmp.lt.u32.totalorder %s1904_s30, %s2485_s11 }
 0xbc7   : > { %p1906_p8 = pnand %p1905_p10, %p2183_p9 }
 0xbc8   : > { %p1911_p6 = por %p1910_p4, %p1909_p1 }
 0xbc9   : > { %p1907_p0 = pneg %p1906_p8 }
 0xbca   : > { %p1913_p11 = por %p1912_p12, %p1911_p6 }
 0xbcc   : > { %p1914_p5 = pnand %p1913_p11, %p1907_p0 }
 0xbce   : > { %1917 = shalt.err (!%p1914_p5)
}
 0xbcf   : > { %s2037_s22 = smov 2   ;;  %s2526_s30 = scalar_lea.hbm %s2600_s4, %s2489_s24  ;;  %v1285_v59 = vpop.permute.xlu1 %1284  ;;  %v1173_v57 = vpop.permute.xlu0 %1172 }
 0xbd0   : > { %1643 = dma.vmem_to_hbm [thread:$0]  (%p2183_p9), %s2487_s2, 128, %s2485_s11, %s1302_s14, %s2032_s25, %s2032_s25, %s2037_s22   ;;  %1287 = vst.msk [vmem:[#allocation4] sm:$0x3] %vm412_vm3, %v1285_v59  ;;  %1175 = vst.msk [vmem:[#allocation3] sm:$0x3] %vm412_vm3, %v1173_v57 }
 0xbd1   : > { %s2642_s0 = sshll.u32 %s2337_s13, 4  ;;  %1300 = vst.msk [vmem:[%s2337_s13] sm:$0x3] %vm412_vm3, %v1285_v59  ;;  %s1307_s9 = scalar_lea.sflag [#allocation14], %s2320_s28  ;;  %s2530_s0 = int_to_ptr.vmem [resolvable:$true] %s2642_s0 }
 0xbd2   : > { %s1918_s7 = scalar_lea.vmem %s2530_s0, 128  ;;  %p2643_p13 = scmp.ne.s32.totalorder %s2631_s5, 0 }
 0xbd3   : > { %p1919_p9 = scmp.ne.s32.totalorder %s2530_s0, %s1918_s7  ;;  %s2038_s2 = smov [#allocation13]  }
 0xbd4   : > { %s1922_s11 = sshll.u32 %s2038_s2, 4  ;;  %s1923_s11 = int_to_ptr.vmem [resolvable:$false] %s1922_s11 }
 0xbd5   : > { %p1920_p2 = pnand %p1919_p9, %p2643_p13  ;;  %s1924_s24 = scalar_lea.vmem %s1923_s11, 256 }
 0xbd6   : > { %p1925_p3 = scmp.lt.s32.totalorder %s2530_s0, %s1923_s11  ;;  %p1926_p10 = scmp.lt.s32.totalorder %s1924_s24, %s1918_s7 }
 0xbd7   : > { %p1921_p7 = pneg %p1920_p2 }
 0xbd8   : > { %p1927_p8 = por %p1926_p10, %p1925_p3 }
 0xbda   : > { %p1928_p0 = pnand %p1927_p8, %p1921_p7 }
 0xbdc   : > { %1931 = shalt.err (!%p1928_p0)
}
 0xbdd   : > { %s1932_s13 = scalar_lea.hbm %s2526_s30, 128  ;;  %s1936_s10 = scalar_lea.hbm %s2600_s4, 256 }
 0xbde   : > { %p1933_p1 = scmp.ne.s32.totalorder %s2526_s30, %s1932_s13  ;;  %p1937_p12 = scmp.lt.u32.totalorder %s2526_s30, %s2600_s4 }
 0xbdf   : > { %p1938_p11 = scmp.lt.u32.totalorder %s1936_s10, %s1932_s13  ;;  %p1940_p9 = scmp.lt.u32.totalorder %s1932_s13, %s2526_s30 }
 0xbe0   : > { %p1934_p4 = pnand %p1933_p1, %p2643_p13 }
 0xbe1   : > { %p1939_p5 = por %p1938_p11, %p1937_p12 }
 0xbe2   : > { %p1935_p6 = pneg %p1934_p4 }
 0xbe3   : > { %p1941_p2 = por %p1940_p9, %p1939_p5 }
 0xbe5   : > { %p1942_p7 = pnand %p1941_p2, %p1935_p6 }
 0xbe7   : > { %1945 = shalt.err (!%p1942_p7)
}
 0xbe8   : > { %1644 = dma.vmem_to_hbm [thread:$0]  (%p2643_p13), %s2530_s0, 128, %s2526_s30, %s1307_s9, %s2032_s25, %s2032_s25, %s2037_s22   ;;  %v1297_v58 = vpop.permute.xlu1 %1296 }
 0xbe9   : > { %1299 = vst.msk [vmem:[#allocation5] sm:$0x3] %vm412_vm3, %v1297_v58 }
 0xbea PF: > { %s1352_s6 = sand.u32 1, %s2008_s18   ;;  %p2644_p3 = scmp.ne.s32.totalorder %s2614_s26, 0 }
 0xbeb   : > { %p2645_p10 = scmp.ge.s32.totalorder %s2020_s21, 2  ;;  %s1353_s5 = scalar_lea.sflag [#allocation8], %s1352_s6 }
 0xbed   : > { %p1659_p8 = pnand %p2645_p10, %p2644_p3 }
 0xbef   : > { %1987 = dma.done.wait (!%p1659_p8), %s1353_s5, 128  }
 0xbf0   : > { %1989 = vsyncadd (!%p1659_p8), %s1353_s5, 4294967168  ;;  %s1361_s28 = sand.u32 1, %s1996_s15   ;;  %p2646_p0 = scmp.ne.s32.totalorder %s2615_s27, 0 }
 0xbf1   : > { %p2647_p13 = pmov %p2645_p10  ;;  %s1362_s25 = scalar_lea.sflag [#allocation14], %s1361_s28 }
 0xbf3   : > { %p1662_p1 = pnand %p2647_p13, %p2646_p0 }
 0xbf5   : > { %1991 = dma.done.wait (!%p1662_p1), %s1362_s25, 128  }
 0xbf6   : > { %1993 = vsyncadd (!%p1662_p1), %s1362_s25, 4294967168  ;;  %s2648_s21 = sld [smem:[#allocation20_spill]]  ;;  %s2649_s26 = sld [smem:[#allocation21_spill]] }
 0xbf7   : > { %s2650_s15 = smov %s2000_s16  ;;  %s2651_s16 = smov %s2004_s17 }
 0xbf8   : > { %s2652_s17 = smov %s2258_s23  ;;  %s2653_s18 = smov %s2012_s19 }
 0xbf9   : > { %s2654_s19 = smov %s2016_s20 }
 0xbfc   : > { %p24_p4 = scmp.ge.s32.totalorder %s2648_s21, 4   ;;  %s2655_s20 = smov %s2649_s26 }
 0xbfe   :  { %26 = sbr.rel (!%p24_p4) target bundleno = 14 (0xe), region = 128 }
 0xc05   :  { %1367 = vsyncpa [#allocation7], 1 }
 0xc06   :  { %1369 = vsyncpa [#allocation7 + $0x1], 1 }
 0xc07   :  { %1370 = vsyncpa [#allocation10], 1 }
 0xc08   :  { %1372 = vsyncpa [#allocation10 + $0x1], 1 }
 0xc09   :  { %1373 = vsyncpa [#allocation8], 1 }
 0xc0a   :  { %1375 = vsyncpa [#allocation8 + $0x1], 1 }
 0xc0b   :  { %1376 = vsyncpa [#allocation14], 1 }
 0xc0c   :  { %1378 = vsyncpa [#allocation14 + $0x1], 1 }

</bundles_post_ra>
